<compile_context>
chip_gen: v7x
topology: tpu7x:2x2x1
jax: 0.10.0
libtpu: 0.0.40
codegen_flags: <defaults>
</compile_context>

<pallas_src>
import functools
import math

import numpy as np
import jax
import jax.numpy as jnp
from jax.experimental import pallas as pl
from jax.experimental.pallas import tpu as pltpu


# ----------------------------- tiling helper -------------------------------- #

def _pick_block(dim, pref, align):
    """Largest power-of-two tile <= pref that divides `dim` and is a multiple of
    `align`; falls back to the full dimension (always layout-legal)."""
    t = pref
    while t >= align:
        if dim % t == 0:
            return t
        t //= 2
    return dim


# --------------------------- tiled linear kernel ---------------------------- #

def _matmul_kernel(x_ref, w_ref, o_ref):
    # Full-K panels: one MXU matmul per grid step, f32 accumulation, no scratch.
    o_ref[...] = jnp.dot(
        x_ref[...].astype(jnp.bfloat16),
        w_ref[...].astype(jnp.bfloat16),
        preferred_element_type=jnp.float32,
    ).astype(o_ref.dtype)


def pallas_linear(x2d, w_t, *, out_dtype=None, tm=512, tn=512,
                  vmem_budget_bytes=12 * 1024 * 1024):
    """x2d: (M, d_in); w_t: (d_in, d_out) pre-transposed bf16 weight -> (M, d_out)."""
    M, K = x2d.shape
    K2, N = w_t.shape
    assert K == K2
    out_dtype = out_dtype if out_dtype is not None else x2d.dtype

    bx = np.dtype(x2d.dtype).itemsize
    bw = np.dtype(w_t.dtype).itemsize
    bo = np.dtype(out_dtype).itemsize

    tm = _pick_block(M, tm, 8)
    tn = _pick_block(N, tn, 128)

    def vmem_est(tm_, tn_):   # double-buffered x / w panels + output tile
        return 2 * (tm_ * K * bx + K * tn_ * bw + tm_ * tn_ * bo)

    def can_halve(t, dim, align):
        h = t // 2
        return h >= align and dim % h == 0 and h % align == 0

    # Shrink tiles until the estimate fits the (v5e-default-safe) VMEM budget.
    while vmem_est(tm, tn) > vmem_budget_bytes:
        if tm >= tn and can_halve(tm, M, 8):
            tm //= 2
        elif can_halve(tn, N, 128):
            tn //= 2
        elif can_halve(tm, M, 8):
            tm //= 2
        else:
            break

    grid = (M // tm, N // tn)
    return pl.pallas_call(
        _matmul_kernel,
        out_shape=jax.ShapeDtypeStruct((M, N), out_dtype),
        grid_spec=pltpu.PrefetchScalarGridSpec(
            num_scalar_prefetch=0,
            grid=grid,
            in_specs=[
                pl.BlockSpec((tm, K), lambda i, j: (i, 0)),
                pl.BlockSpec((K, tn), lambda i, j: (0, j)),
            ],
            out_specs=pl.BlockSpec((tm, tn), lambda i, j: (i, j)),
        ),
        compiler_params=pltpu.CompilerParams(
            dimension_semantics=("parallel", "parallel")),
    )(x2d, w_t)


# ----------------------- flash-style causal attention ----------------------- #

def _flash_attn_kernel(qi_tbl, ki_tbl, q_ref, k_ref, v_ref, o_ref,
                       qs_sc, m_sc, l_sc, acc_sc, *, scale):
    t = pl.program_id(1)
    qi = qi_tbl[t]
    ki = ki_tbl[t]

    # First kv step of this q-tile group: reset online-softmax state and stage the
    # scale-folded q tile (bf16) in VMEM, so no per-step (tq,tk) scaling is needed.
    @pl.when(ki == 0)
    def _init():
        qs_sc[...] = (q_ref[0].astype(jnp.float32) * scale).astype(qs_sc.dtype)
        m_sc[...] = jnp.full_like(m_sc, -jnp.inf)
        l_sc[...] = jnp.zeros_like(l_sc)
        acc_sc[...] = jnp.zeros_like(acc_sc)

    def _accumulate(is_diagonal):
        q = qs_sc[...]                       # (H, tq, Dh) bf16, pre-scaled
        k = k_ref[0]                         # (H, tk, Dh) bf16
        v = v_ref[0]                         # (H, tk, Dh) bf16
        # Head-batched (tq,Dh)x(Dh,tk) matmuls on the MXU, f32 accumulation.
        s = jnp.einsum('hqd,hkd->hqk', q, k,
                       preferred_element_type=jnp.float32)
        if is_diagonal:
            # tq == tk, so the diagonal tile only needs LOCAL indices for the mask.
            tq, tk = s.shape[-2], s.shape[-1]
            row = jax.lax.broadcasted_iota(jnp.int32, (tq, tk), 0)
            col = jax.lax.broadcasted_iota(jnp.int32, (tq, tk), 1)
            s = jnp.where((col <= row)[None, :, :], s, -jnp.inf)
        m_prev = m_sc[...]
        m_new = jnp.maximum(m_prev, jnp.max(s, axis=-1, keepdims=True))
        alpha = jnp.exp(m_prev - m_new)
        p = jnp.exp(s - m_new)
        l_sc[...] = alpha * l_sc[...] + jnp.sum(p, axis=-1, keepdims=True)
        acc_sc[...] = alpha * acc_sc[...] + jnp.einsum(
            'hqk,hkd->hqd', p.astype(v.dtype), v,
            preferred_element_type=jnp.float32)
        m_sc[...] = m_new

    # Strictly-below-diagonal tiles: no mask needed.
    @pl.when(ki < qi)
    def _off_diag():
        _accumulate(is_diagonal=False)

    # Diagonal tile: this is always the LAST kv step of the q-tile group (triangular
    # enumeration), so apply the causal mask and write the normalized output.
    @pl.when(ki == qi)
    def _diag_and_finalize():
        _accumulate(is_diagonal=True)
        o_ref[0] = (acc_sc[...] / l_sc[...]).astype(o_ref.dtype)


def pallas_causal_mha(q, k, v, *, block=512, vmem_budget_bytes=12 * 1024 * 1024):
    """q, k, v: (B, H, S, Dh) bf16 -> (B, H, S, Dh) causal softmax attention."""
    B, H, S, Dh = q.shape
    blk = _pick_block(S, min(block, S), 8)    # tq == tk (keeps diagonal logic local)

    def vmem_est(b):
        inputs = 3 * 2 * (H * b * Dh * 2)             # double-buffered bf16 q/k/v
        output = 2 * (H * b * Dh * 2)                 # double-buffered bf16 out
        scratch = H * b * Dh * (2 + 4) + 2 * H * b * 4  # qs(bf16)+acc(f32)+m,l(f32)
        return inputs + output + scratch

    while (vmem_est(blk) > vmem_budget_bytes and blk > 128
           and S % (blk // 2) == 0 and (blk // 2) % 8 == 0):
        blk //= 2

    # Flattened lower-triangular (qi, ki) enumeration: no grid steps above the
    # diagonal, so no wasted per-step pipeline overhead.  Tables go in via scalar
    # prefetch and drive both the kernel's pl.when gates and the BlockSpec index maps.
    T = S // blk
    pairs = [(qi, ki) for qi in range(T) for ki in range(qi + 1)]
    qi_tbl = jnp.asarray([p[0] for p in pairs], dtype=jnp.int32)
    ki_tbl = jnp.asarray([p[1] for p in pairs], dtype=jnp.int32)

    scale = 1.0 / math.sqrt(Dh)
    q_map = lambda b, t, qi_t, ki_t: (b, 0, qi_t[t], 0)
    kv_map = lambda b, t, qi_t, ki_t: (b, 0, ki_t[t], 0)

    return pl.pallas_call(
        functools.partial(_flash_attn_kernel, scale=scale),
        out_shape=jax.ShapeDtypeStruct((B, H, S, Dh), q.dtype),
        grid_spec=pltpu.PrefetchScalarGridSpec(
            num_scalar_prefetch=2,
            grid=(B, len(pairs)),
            in_specs=[
                pl.BlockSpec((1, H, blk, Dh), q_map),
                pl.BlockSpec((1, H, blk, Dh), kv_map),
                pl.BlockSpec((1, H, blk, Dh), kv_map),
            ],
            out_specs=pl.BlockSpec((1, H, blk, Dh), q_map),
            scratch_shapes=[
                pltpu.VMEM((H, blk, Dh), jnp.bfloat16),   # pre-scaled q tile
                pltpu.VMEM((H, blk, 1), jnp.float32),     # running max m
                pltpu.VMEM((H, blk, 1), jnp.float32),     # running denom l
                pltpu.VMEM((H, blk, Dh), jnp.float32),    # output accumulator
            ],
        ),
        compiler_params=pltpu.CompilerParams(
            dimension_semantics=("parallel", "arbitrary")),
    )(qi_tbl, ki_tbl, q, k, v)


# ------------------------------- JAX glue ----------------------------------- #

def rope_tables(theta, d_head, max_seq_len):
    pos = jnp.arange(max_seq_len, dtype=jnp.float32)[:, None]
    freqs = jnp.arange(0, d_head, 2, dtype=jnp.float32) / d_head
    inv_freq = 1.0 / (theta ** freqs)
    angles = pos * inv_freq                          # (max_seq_len, d_head//2)
    return jnp.cos(angles), jnp.sin(angles)


def apply_rope(x, cos, sin):
    # x: (B, H, S, Dh); cos/sin: (S, Dh//2). Interleaved even/odd rotation, matching
    # the PyTorch rearrange semantics exactly (computed in f32).
    x_even = x[..., 0::2].astype(jnp.float32)
    x_odd = x[..., 1::2].astype(jnp.float32)
    r_even = x_even * cos - x_odd * sin
    r_odd = x_even * sin + x_odd * cos
    return jnp.stack([r_even, r_odd], axis=-1).reshape(x.shape)


def trunc_normal(key, shape, std):
    return std * jax.random.truncated_normal(key, -3.0, 3.0, shape, dtype=jnp.float32)


def init_linear_t(key, d_in, d_out):
    # PyTorch Linear stores (d_out, d_in); we pre-transpose ONCE at init and store in
    # bfloat16 so the kernel streams half the HBM bytes and never casts weights.
    std = math.sqrt(2.0 / (d_in + d_out))
    w = trunc_normal(key, (d_out, d_in), std)
    return jnp.asarray(w.T, dtype=jnp.bfloat16)      # (d_in, d_out)


def init_mhsa_params(key, d_model, num_heads):
    assert d_model % num_heads == 0
    k1, k2 = jax.random.split(key)
    return {
        "wqkv_t": init_linear_t(k1, d_model, 3 * d_model),  # (d_model, 3*d_model)
        "wo_t": init_linear_t(k2, d_model, d_model),         # (d_model, d_model)
    }


def causal_mhsa_forward(x, params, rope_cos=None, rope_sin=None,
                        *, num_heads, attn_block=512, token_positions=None):
    """x: (B, S, d_model) -> (B, S, d_model). Matches CausalMultiHeadSelfAttention."""
    B, S, d_model = x.shape
    H = num_heads
    Dh = d_model // H

    # Fused QKV projection (single-shot K, bf16 output for attention).
    qkv = pallas_linear(x.reshape(B * S, d_model), params["wqkv_t"],
                        out_dtype=jnp.bfloat16)
    qkv = qkv.reshape(B, S, 3, H, Dh)                 # free reshape of the qkv slab
    # TODO(synk): index q/k/v + heads straight from this layout via attention
    # BlockSpec index maps to drop these transpose passes over HBM.
    q = qkv[:, :, 0].transpose(0, 2, 1, 3)            # (B, H, S, Dh)
    k = qkv[:, :, 1].transpose(0, 2, 1, 3)
    v = qkv[:, :, 2].transpose(0, 2, 1, 3)

    if rope_cos is not None:
        if token_positions is None:
            token_positions = jnp.arange(S)
        cos = rope_cos[token_positions]
        sin = rope_sin[token_positions]
        # TODO(synk): fuse the interleaved RoPE rotation into the attention kernel.
        q = apply_rope(q, cos, sin)
        k = apply_rope(k, cos, sin)
    q = q.astype(jnp.bfloat16)
    k = k.astype(jnp.bfloat16)
    v = v.astype(jnp.bfloat16)

    y = pallas_causal_mha(q, k, v, block=attn_block)   # (B, H, S, Dh) bf16
    y = y.transpose(0, 2, 1, 3).reshape(B * S, d_model)

    out = pallas_linear(y, params["wo_t"], out_dtype=x.dtype)
    return out.reshape(B, S, d_model)


# --------------------------------- demo -------------------------------------- #

if __name__ == "__main__":
    d_model, num_heads = 64, 4        # Dh = 16
    batch, seq = 2, 16
    theta = 10000.0

    key = jax.random.PRNGKey(0)
    pkey, xkey = jax.random.split(key)
    params = init_mhsa_params(pkey, d_model, num_heads)
    rope_cos, rope_sin = rope_tables(theta, d_model // num_heads, seq)

    x = jax.random.normal(xkey, (batch, seq, d_model), dtype=jnp.float32)

    # attn_block=8 so the tiny demo still exercises the triangular multi-tile grid,
    # scalar-prefetched index tables and the online-softmax accumulation path.
    fwd = jax.jit(functools.partial(causal_mhsa_forward,
                                    num_heads=num_heads, attn_block=8))
    y = fwd(x, params, rope_cos, rope_sin)
    y = jax.block_until_ready(y)

    assert y.shape == (batch, seq, d_model)
    assert bool(jnp.all(jnp.isfinite(y)))
    print("KERNEL_OK")
</pallas_src>

<mosaic_0001>
module attributes {stable_mosaic.version = 11 : i64} {
  func.func @_matmul_kernel(%arg0: i32, %arg1: i32, %arg2: memref<32x64xf32, #tpu.memory_space<vmem>>, %arg3: memref<64x192xbf16, #tpu.memory_space<vmem>>, %arg4: memref<32x192xbf16, #tpu.memory_space<vmem>>) attributes {dimension_semantics = [#tpu.dimension_semantics<parallel>, #tpu.dimension_semantics<parallel>], iteration_bounds = array<i64: 1, 1>, scalar_prefetch = 0 : i64, scratch_operands = 0 : i64, tpu.core_type = #tpu.core_type<tc>, window_params = [{transform_indices = @transform_0, window_bounds = array<i64: 32, 64>}, {transform_indices = @transform_1, window_bounds = array<i64: 64, 192>}, {transform_indices = @transform_2, window_bounds = array<i64: 32, 192>}]} {
    %c0 = arith.constant 0 : index
    %c0_0 = arith.constant 0 : index
    %0 = vector.load %arg2[%c0, %c0_0] : memref<32x64xf32, #tpu.memory_space<vmem>>, vector<32x64xf32>
    %1 = arith.truncf %0 : vector<32x64xf32> to vector<32x64xbf16>
    %c0_1 = arith.constant 0 : index
    %c0_2 = arith.constant 0 : index
    %2 = vector.load %arg3[%c0_1, %c0_2] : memref<64x192xbf16, #tpu.memory_space<vmem>>, vector<64x192xbf16>
    %cst = arith.constant dense<0.000000e+00> : vector<32x192xf32>
    %3 = tpu.matmul %1, %2, %cst {dimension_numbers = #tpu.dot_dimension_numbers<[1], [0], [0], [1], [0, 0, 1, 1], [], []>} : vector<32x64xbf16>, vector<64x192xbf16>, vector<32x192xf32> -> vector<32x192xf32>
    %4 = arith.truncf %3 : vector<32x192xf32> to vector<32x192xbf16>
    %c0_3 = arith.constant 0 : index
    %c0_4 = arith.constant 0 : index
    %5 = vector.load %arg4[%c0_3, %c0_4] : memref<32x192xbf16, #tpu.memory_space<vmem>>, vector<32x192xbf16>
    tpu.vector_store %arg4[%c0_3, %c0_4], %4 {strides = array<i32>} : memref<32x192xbf16, #tpu.memory_space<vmem>>, vector<32x192xbf16>,
    return
  }
  func.func @transform_0(%arg0: i32, %arg1: i32) -> (i32, i32) {
    %c0_i32 = arith.constant 0 : i32
    %c0_i32_0 = arith.constant 0 : i32
    return %arg0, %c0_i32 : i32, i32
  }
  func.func @transform_1(%arg0: i32, %arg1: i32) -> (i32, i32) {
    %c0_i32 = arith.constant 0 : i32
    %c0_i32_0 = arith.constant 0 : i32
    return %c0_i32, %arg1 : i32, i32
  }
  func.func @transform_2(%arg0: i32, %arg1: i32) -> (i32, i32) {
    %c0_i32 = arith.constant 0 : i32
    return %arg0, %arg1 : i32, i32
  }
}

module attributes {stable_mosaic.version = 11 : i64} {
  func.func @_matmul_kernel(%arg0: i32, %arg1: i32, %arg2: memref<32x64xbf16, #tpu.memory_space<vmem>>, %arg3: memref<64x64xbf16, #tpu.memory_space<vmem>>, %arg4: memref<32x64xf32, #tpu.memory_space<vmem>>) attributes {dimension_semantics = [#tpu.dimension_semantics<parallel>, #tpu.dimension_semantics<parallel>], iteration_bounds = array<i64: 1, 1>, scalar_prefetch = 0 : i64, scratch_operands = 0 : i64, tpu.core_type = #tpu.core_type<tc>, window_params = [{transform_indices = @transform_0, window_bounds = array<i64: 32, 64>}, {transform_indices = @transform_1, window_bounds = array<i64: 64, 64>}, {transform_indices = @transform_2, window_bounds = array<i64: 32, 64>}]} {
    %c0 = arith.constant 0 : index
    %c0_0 = arith.constant 0 : index
    %0 = vector.load %arg2[%c0, %c0_0] : memref<32x64xbf16, #tpu.memory_space<vmem>>, vector<32x64xbf16>
    %c0_1 = arith.constant 0 : index
    %c0_2 = arith.constant 0 : index
    %1 = vector.load %arg3[%c0_1, %c0_2] : memref<64x64xbf16, #tpu.memory_space<vmem>>, vector<64x64xbf16>
    %cst = arith.constant dense<0.000000e+00> : vector<32x64xf32>
    %2 = tpu.matmul %0, %1, %cst {dimension_numbers = #tpu.dot_dimension_numbers<[1], [0], [0], [1], [0, 0, 1, 1], [], []>} : vector<32x64xbf16>, vector<64x64xbf16>, vector<32x64xf32> -> vector<32x64xf32>
    %c0_3 = arith.constant 0 : index
    %c0_4 = arith.constant 0 : index
    %3 = vector.load %arg4[%c0_3, %c0_4] : memref<32x64xf32, #tpu.memory_space<vmem>>, vector<32x64xf32>
    tpu.vector_store %arg4[%c0_3, %c0_4], %2 {strides = array<i32>} : memref<32x64xf32, #tpu.memory_space<vmem>>, vector<32x64xf32>,
    return
  }
  func.func @transform_0(%arg0: i32, %arg1: i32) -> (i32, i32) {
    %c0_i32 = arith.constant 0 : i32
    %c0_i32_0 = arith.constant 0 : i32
    return %arg0, %c0_i32 : i32, i32
  }
  func.func @transform_1(%arg0: i32, %arg1: i32) -> (i32, i32) {
    %c0_i32 = arith.constant 0 : i32
    %c0_i32_0 = arith.constant 0 : i32
    return %c0_i32, %arg1 : i32, i32
  }
  func.func @transform_2(%arg0: i32, %arg1: i32) -> (i32, i32) {
    %c0_i32 = arith.constant 0 : i32
    return %arg0, %arg1 : i32, i32
  }
}

module attributes {stable_mosaic.version = 11 : i64} {
  func.func @_flash_attn_kernel(%arg0: i32, %arg1: i32, %arg2: memref<3xi32, #tpu.memory_space<smem>>, %arg3: memref<3xi32, #tpu.memory_space<smem>>, %arg4: memref<1x4x8x16xbf16, #tpu.memory_space<vmem>>, %arg5: memref<1x4x8x16xbf16, #tpu.memory_space<vmem>>, %arg6: memref<1x4x8x16xbf16, #tpu.memory_space<vmem>>, %arg7: memref<1x4x8x16xbf16, #tpu.memory_space<vmem>>, %arg8: memref<4x8x16xbf16, #tpu.memory_space<vmem>>, %arg9: memref<4x8x1xf32, #tpu.memory_space<vmem>>, %arg10: memref<4x8x1xf32, #tpu.memory_space<vmem>>, %arg11: memref<4x8x16xf32, #tpu.memory_space<vmem>>) attributes {dimension_semantics = [#tpu.dimension_semantics<parallel>, #tpu.dimension_semantics<arbitrary>], iteration_bounds = array<i64: 2, 3>, scalar_prefetch = 2 : i64, scratch_operands = 4 : i64, tpu.core_type = #tpu.core_type<tc>, window_params = [{transform_indices = @transform_0, window_bounds = array<i64: 1, 4, 8, 16>}, {transform_indices = @transform_1, window_bounds = array<i64: 1, 4, 8, 16>}, {transform_indices = @transform_2, window_bounds = array<i64: 1, 4, 8, 16>}, {transform_indices = @transform_3, window_bounds = array<i64: 1, 4, 8, 16>}]} {
    %0 = arith.index_cast %arg1 : i32 to index
    %1 = memref.load %arg2[%0] : memref<3xi32, #tpu.memory_space<smem>>
    %2 = arith.index_cast %arg1 : i32 to index
    %3 = memref.load %arg3[%2] : memref<3xi32, #tpu.memory_space<smem>>
    %c0_i32 = arith.constant 0 : i32
    %4 = arith.cmpi eq, %3, %c0_i32 : i32
    %5 = arith.extui %4 : i1 to i32
    %c0_i32_0 = arith.constant 0 : i32
    %6 = arith.cmpi ne, %5, %c0_i32_0 : i32
    scf.if %6 {
      %c0 = arith.constant 0 : index
      %c0_3 = arith.constant 0 : index
      %c0_4 = arith.constant 0 : index
      %c0_5 = arith.constant 0 : index
      %13 = vector.load %arg4[%c0, %c0_3, %c0_4, %c0_5] : memref<1x4x8x16xbf16, #tpu.memory_space<vmem>>, vector<1x4x8x16xbf16>
      %14 = vector.shape_cast %13 : vector<1x4x8x16xbf16> to vector<4x8x16xbf16>
      %15 = arith.extf %14 : vector<4x8x16xbf16> to vector<4x8x16xf32>
      %cst = arith.constant 2.500000e-01 : f32
      %16 = vector.broadcast %cst : f32 to vector<4x8x16xf32>
      %17 = arith.mulf %15, %16 : vector<4x8x16xf32>
      %18 = arith.truncf %17 : vector<4x8x16xf32> to vector<4x8x16xbf16>
      %c0_6 = arith.constant 0 : index
      %c0_7 = arith.constant 0 : index
      %c0_8 = arith.constant 0 : index
      %19 = vector.load %arg8[%c0_6, %c0_7, %c0_8] : memref<4x8x16xbf16, #tpu.memory_space<vmem>>, vector<4x8x16xbf16>
      tpu.vector_store %arg8[%c0_6, %c0_7, %c0_8], %18 {strides = array<i32>} : memref<4x8x16xbf16, #tpu.memory_space<vmem>>, vector<4x8x16xbf16>,
      %cst_9 = arith.constant 0xFF800000 : f32
      %20 = vector.broadcast %cst_9 : f32 to vector<4x8x1xf32>
      %c0_10 = arith.constant 0 : index
      %c0_11 = arith.constant 0 : index
      %c0_12 = arith.constant 0 : index
      %21 = vector.load %arg9[%c0_10, %c0_11, %c0_12] : memref<4x8x1xf32, #tpu.memory_space<vmem>>, vector<4x8x1xf32>
      tpu.vector_store %arg9[%c0_10, %c0_11, %c0_12], %20 {strides = array<i32>} : memref<4x8x1xf32, #tpu.memory_space<vmem>>, vector<4x8x1xf32>,
      %cst_13 = arith.constant 0.000000e+00 : f32
      %22 = vector.broadcast %cst_13 : f32 to vector<4x8x1xf32>
      %c0_14 = arith.constant 0 : index
      %c0_15 = arith.constant 0 : index
      %c0_16 = arith.constant 0 : index
      %23 = vector.load %arg10[%c0_14, %c0_15, %c0_16] : memref<4x8x1xf32, #tpu.memory_space<vmem>>, vector<4x8x1xf32>
      tpu.vector_store %arg10[%c0_14, %c0_15, %c0_16], %22 {strides = array<i32>} : memref<4x8x1xf32, #tpu.memory_space<vmem>>, vector<4x8x1xf32>,
      %cst_17 = arith.constant 0.000000e+00 : f32
      %24 = vector.broadcast %cst_17 : f32 to vector<4x8x16xf32>
      %c0_18 = arith.constant 0 : index
      %c0_19 = arith.constant 0 : index
      %c0_20 = arith.constant 0 : index
      %25 = vector.load %arg11[%c0_18, %c0_19, %c0_20] : memref<4x8x16xf32, #tpu.memory_space<vmem>>, vector<4x8x16xf32>
      tpu.vector_store %arg11[%c0_18, %c0_19, %c0_20], %24 {strides = array<i32>} : memref<4x8x16xf32, #tpu.memory_space<vmem>>, vector<4x8x16xf32>,
    } else {
    }
    %7 = arith.cmpi slt, %3, %1 : i32
    %8 = arith.extui %7 : i1 to i32
    %c0_i32_1 = arith.constant 0 : i32
    %9 = arith.cmpi ne, %8, %c0_i32_1 : i32
    scf.if %9 {
      %c0 = arith.constant 0 : index
      %c0_3 = arith.constant 0 : index
      %c0_4 = arith.constant 0 : index
      %13 = vector.load %arg8[%c0, %c0_3, %c0_4] : memref<4x8x16xbf16, #tpu.memory_space<vmem>>, vector<4x8x16xbf16>
      %c0_5 = arith.constant 0 : index
      %c0_6 = arith.constant 0 : index
      %c0_7 = arith.constant 0 : index
      %c0_8 = arith.constant 0 : index
      %14 = vector.load %arg5[%c0_5, %c0_6, %c0_7, %c0_8] : memref<1x4x8x16xbf16, #tpu.memory_space<vmem>>, vector<1x4x8x16xbf16>
      %15 = vector.shape_cast %14 : vector<1x4x8x16xbf16> to vector<4x8x16xbf16>
      %c0_9 = arith.constant 0 : index
      %c0_10 = arith.constant 0 : index
      %c0_11 = arith.constant 0 : index
      %c0_12 = arith.constant 0 : index
      %16 = vector.load %arg6[%c0_9, %c0_10, %c0_11, %c0_12] : memref<1x4x8x16xbf16, #tpu.memory_space<vmem>>, vector<1x4x8x16xbf16>
      %17 = vector.shape_cast %16 : vector<1x4x8x16xbf16> to vector<4x8x16xbf16>
      "tpu.trace_start"() <{level = 10 : i32, message = "hqd,hkd->hqk"}> : () -> ()
      %cst = arith.constant dense<0.000000e+00> : vector<4x8x8xf32>
      %18 = tpu.matmul %13, %15, %cst {dimension_numbers = #tpu.dot_dimension_numbers<[2], [2], [1], [1], [0, 0, 0, 1, 1, 1], [0], [0]>} : vector<4x8x16xbf16>, vector<4x8x16xbf16>, vector<4x8x8xf32> -> vector<4x8x8xf32>
      "tpu.trace_stop"() : () -> ()
      %c0_13 = arith.constant 0 : index
      %c0_14 = arith.constant 0 : index
      %c0_15 = arith.constant 0 : index
      %19 = vector.load %arg9[%c0_13, %c0_14, %c0_15] : memref<4x8x1xf32, #tpu.memory_space<vmem>>, vector<4x8x1xf32>
      %cst_16 = arith.constant dense<0xFF800000> : vector<4x8xf32>
      %20 = vector.multi_reduction <maximumf>, %18, %cst_16 [2] : vector<4x8x8xf32> to vector<4x8xf32>
      %21 = vector.shape_cast %20 : vector<4x8xf32> to vector<4x8x1xf32>
      %22 = arith.maximumf %19, %21 : vector<4x8x1xf32>
      %23 = arith.subf %19, %22 : vector<4x8x1xf32>
      %24 = math.exp %23 : vector<4x8x1xf32>
      %25 = vector.broadcast %22 : vector<4x8x1xf32> to vector<4x8x8xf32>
      %26 = arith.subf %18, %25 : vector<4x8x8xf32>
      %27 = math.exp %26 : vector<4x8x8xf32>
      %c0_17 = arith.constant 0 : index
      %c0_18 = arith.constant 0 : index
      %c0_19 = arith.constant 0 : index
      %28 = vector.load %arg10[%c0_17, %c0_18, %c0_19] : memref<4x8x1xf32, #tpu.memory_space<vmem>>, vector<4x8x1xf32>
      %29 = arith.mulf %24, %28 : vector<4x8x1xf32>
      %cst_20 = arith.constant dense<0.000000e+00> : vector<4x8xf32>
      %30 = vector.multi_reduction <add>, %27, %cst_20 [2] : vector<4x8x8xf32> to vector<4x8xf32>
      %31 = vector.shape_cast %30 : vector<4x8xf32> to vector<4x8x1xf32>
      %32 = arith.addf %29, %31 : vector<4x8x1xf32>
      %c0_21 = arith.constant 0 : index
      %c0_22 = arith.constant 0 : index
      %c0_23 = arith.constant 0 : index
      %33 = vector.load %arg10[%c0_21, %c0_22, %c0_23] : memref<4x8x1xf32, #tpu.memory_space<vmem>>, vector<4x8x1xf32>
      tpu.vector_store %arg10[%c0_21, %c0_22, %c0_23], %32 {strides = array<i32>} : memref<4x8x1xf32, #tpu.memory_space<vmem>>, vector<4x8x1xf32>,
      %c0_24 = arith.constant 0 : index
      %c0_25 = arith.constant 0 : index
      %c0_26 = arith.constant 0 : index
      %34 = vector.load %arg11[%c0_24, %c0_25, %c0_26] : memref<4x8x16xf32, #tpu.memory_space<vmem>>, vector<4x8x16xf32>
      %35 = vector.broadcast %24 : vector<4x8x1xf32> to vector<4x8x16xf32>
      %36 = arith.mulf %35, %34 : vector<4x8x16xf32>
      %37 = arith.truncf %27 : vector<4x8x8xf32> to vector<4x8x8xbf16>
      "tpu.trace_start"() <{level = 10 : i32, message = "hqk,hkd->hqd"}> : () -> ()
      %cst_27 = arith.constant dense<0.000000e+00> : vector<4x8x16xf32>
      %38 = tpu.matmul %37, %17, %cst_27 {dimension_numbers = #tpu.dot_dimension_numbers<[2], [1], [1], [2], [0, 0, 0, 1, 1, 2], [0], [0]>} : vector<4x8x8xbf16>, vector<4x8x16xbf16>, vector<4x8x16xf32> -> vector<4x8x16xf32>
      "tpu.trace_stop"() : () -> ()
      %39 = arith.addf %36, %38 : vector<4x8x16xf32>
      %c0_28 = arith.constant 0 : index
      %c0_29 = arith.constant 0 : index
      %c0_30 = arith.constant 0 : index
      %40 = vector.load %arg11[%c0_28, %c0_29, %c0_30] : memref<4x8x16xf32, #tpu.memory_space<vmem>>, vector<4x8x16xf32>
      tpu.vector_store %arg11[%c0_28, %c0_29, %c0_30], %39 {strides = array<i32>} : memref<4x8x16xf32, #tpu.memory_space<vmem>>, vector<4x8x16xf32>,
      %c0_31 = arith.constant 0 : index
      %c0_32 = arith.constant 0 : index
      %c0_33 = arith.constant 0 : index
      %41 = vector.load %arg9[%c0_31, %c0_32, %c0_33] : memref<4x8x1xf32, #tpu.memory_space<vmem>>, vector<4x8x1xf32>
      tpu.vector_store %arg9[%c0_31, %c0_32, %c0_33], %22 {strides = array<i32>} : memref<4x8x1xf32, #tpu.memory_space<vmem>>, vector<4x8x1xf32>,
    } else {
    }
    %10 = arith.cmpi eq, %3, %1 : i32
    %11 = arith.extui %10 : i1 to i32
    %c0_i32_2 = arith.constant 0 : i32
    %12 = arith.cmpi ne, %11, %c0_i32_2 : i32
    scf.if %12 {
      %c0 = arith.constant 0 : index
      %c0_3 = arith.constant 0 : index
      %c0_4 = arith.constant 0 : index
      %13 = vector.load %arg8[%c0, %c0_3, %c0_4] : memref<4x8x16xbf16, #tpu.memory_space<vmem>>, vector<4x8x16xbf16>
      %c0_5 = arith.constant 0 : index
      %c0_6 = arith.constant 0 : index
      %c0_7 = arith.constant 0 : index
      %c0_8 = arith.constant 0 : index
      %14 = vector.load %arg5[%c0_5, %c0_6, %c0_7, %c0_8] : memref<1x4x8x16xbf16, #tpu.memory_space<vmem>>, vector<1x4x8x16xbf16>
      %15 = vector.shape_cast %14 : vector<1x4x8x16xbf16> to vector<4x8x16xbf16>
      %c0_9 = arith.constant 0 : index
      %c0_10 = arith.constant 0 : index
      %c0_11 = arith.constant 0 : index
      %c0_12 = arith.constant 0 : index
      %16 = vector.load %arg6[%c0_9, %c0_10, %c0_11, %c0_12] : memref<1x4x8x16xbf16, #tpu.memory_space<vmem>>, vector<1x4x8x16xbf16>
      %17 = vector.shape_cast %16 : vector<1x4x8x16xbf16> to vector<4x8x16xbf16>
      "tpu.trace_start"() <{level = 10 : i32, message = "hqd,hkd->hqk"}> : () -> ()
      %cst = arith.constant dense<0.000000e+00> : vector<4x8x8xf32>
      %18 = tpu.matmul %13, %15, %cst {dimension_numbers = #tpu.dot_dimension_numbers<[2], [2], [1], [1], [0, 0, 0, 1, 1, 1], [0], [0]>} : vector<4x8x16xbf16>, vector<4x8x16xbf16>, vector<4x8x8xf32> -> vector<4x8x8xf32>
      "tpu.trace_stop"() : () -> ()
      %19 = tpu.iota {dimensions = array<i32: 0>} : vector<8x8xi32>
      %20 = tpu.iota {dimensions = array<i32: 1>} : vector<8x8xi32>
      %21 = arith.cmpi sle, %20, %19 : vector<8x8xi32>
      %22 = vector.shape_cast %21 : vector<8x8xi1> to vector<1x8x8xi1>
      %cst_13 = arith.constant 0xFF800000 : f32
      %23 = vector.shape_cast %22 : vector<1x8x8xi1> to vector<1x8x8xi1>
      %24 = vector.broadcast %23 : vector<1x8x8xi1> to vector<4x8x8xi1>
      %25 = vector.broadcast %cst_13 : f32 to vector<4x8x8xf32>
      %26 = arith.select %24, %18, %25 : vector<4x8x8xi1>, vector<4x8x8xf32>
      %c0_14 = arith.constant 0 : index
      %c0_15 = arith.constant 0 : index
      %c0_16 = arith.constant 0 : index
      %27 = vector.load %arg9[%c0_14, %c0_15, %c0_16] : memref<4x8x1xf32, #tpu.memory_space<vmem>>, vector<4x8x1xf32>
      %cst_17 = arith.constant dense<0xFF800000> : vector<4x8xf32>
      %28 = vector.multi_reduction <maximumf>, %26, %cst_17 [2] : vector<4x8x8xf32> to vector<4x8xf32>
      %29 = vector.shape_cast %28 : vector<4x8xf32> to vector<4x8x1xf32>
      %30 = arith.maximumf %27, %29 : vector<4x8x1xf32>
      %31 = arith.subf %27, %30 : vector<4x8x1xf32>
      %32 = math.exp %31 : vector<4x8x1xf32>
      %33 = vector.broadcast %30 : vector<4x8x1xf32> to vector<4x8x8xf32>
      %34 = arith.subf %26, %33 : vector<4x8x8xf32>
      %35 = math.exp %34 : vector<4x8x8xf32>
      %c0_18 = arith.constant 0 : index
      %c0_19 = arith.constant 0 : index
      %c0_20 = arith.constant 0 : index
      %36 = vector.load %arg10[%c0_18, %c0_19, %c0_20] : memref<4x8x1xf32, #tpu.memory_space<vmem>>, vector<4x8x1xf32>
      %37 = arith.mulf %32, %36 : vector<4x8x1xf32>
      %cst_21 = arith.constant dense<0.000000e+00> : vector<4x8xf32>
      %38 = vector.multi_reduction <add>, %35, %cst_21 [2] : vector<4x8x8xf32> to vector<4x8xf32>
      %39 = vector.shape_cast %38 : vector<4x8xf32> to vector<4x8x1xf32>
      %40 = arith.addf %37, %39 : vector<4x8x1xf32>
      %c0_22 = arith.constant 0 : index
      %c0_23 = arith.constant 0 : index
      %c0_24 = arith.constant 0 : index
      %41 = vector.load %arg10[%c0_22, %c0_23, %c0_24] : memref<4x8x1xf32, #tpu.memory_space<vmem>>, vector<4x8x1xf32>
      tpu.vector_store %arg10[%c0_22, %c0_23, %c0_24], %40 {strides = array<i32>} : memref<4x8x1xf32, #tpu.memory_space<vmem>>, vector<4x8x1xf32>,
      %c0_25 = arith.constant 0 : index
      %c0_26 = arith.constant 0 : index
      %c0_27 = arith.constant 0 : index
      %42 = vector.load %arg11[%c0_25, %c0_26, %c0_27] : memref<4x8x16xf32, #tpu.memory_space<vmem>>, vector<4x8x16xf32>
      %43 = vector.broadcast %32 : vector<4x8x1xf32> to vector<4x8x16xf32>
      %44 = arith.mulf %43, %42 : vector<4x8x16xf32>
      %45 = arith.truncf %35 : vector<4x8x8xf32> to vector<4x8x8xbf16>
      "tpu.trace_start"() <{level = 10 : i32, message = "hqk,hkd->hqd"}> : () -> ()
      %cst_28 = arith.constant dense<0.000000e+00> : vector<4x8x16xf32>
      %46 = tpu.matmul %45, %17, %cst_28 {dimension_numbers = #tpu.dot_dimension_numbers<[2], [1], [1], [2], [0, 0, 0, 1, 1, 2], [0], [0]>} : vector<4x8x8xbf16>, vector<4x8x16xbf16>, vector<4x8x16xf32> -> vector<4x8x16xf32>
      "tpu.trace_stop"() : () -> ()
      %47 = arith.addf %44, %46 : vector<4x8x16xf32>
      %c0_29 = arith.constant 0 : index
      %c0_30 = arith.constant 0 : index
      %c0_31 = arith.constant 0 : index
      %48 = vector.load %arg11[%c0_29, %c0_30, %c0_31] : memref<4x8x16xf32, #tpu.memory_space<vmem>>, vector<4x8x16xf32>
      tpu.vector_store %arg11[%c0_29, %c0_30, %c0_31], %47 {strides = array<i32>} : memref<4x8x16xf32, #tpu.memory_space<vmem>>, vector<4x8x16xf32>,
      %c0_32 = arith.constant 0 : index
      %c0_33 = arith.constant 0 : index
      %c0_34 = arith.constant 0 : index
      %49 = vector.load %arg9[%c0_32, %c0_33, %c0_34] : memref<4x8x1xf32, #tpu.memory_space<vmem>>, vector<4x8x1xf32>
      tpu.vector_store %arg9[%c0_32, %c0_33, %c0_34], %30 {strides = array<i32>} : memref<4x8x1xf32, #tpu.memory_space<vmem>>, vector<4x8x1xf32>,
      %c0_35 = arith.constant 0 : index
      %c0_36 = arith.constant 0 : index
      %c0_37 = arith.constant 0 : index
      %50 = vector.load %arg11[%c0_35, %c0_36, %c0_37] : memref<4x8x16xf32, #tpu.memory_space<vmem>>, vector<4x8x16xf32>
      %c0_38 = arith.constant 0 : index
      %c0_39 = arith.constant 0 : index
      %c0_40 = arith.constant 0 : index
      %51 = vector.load %arg10[%c0_38, %c0_39, %c0_40] : memref<4x8x1xf32, #tpu.memory_space<vmem>>, vector<4x8x1xf32>
      %52 = vector.broadcast %51 : vector<4x8x1xf32> to vector<4x8x16xf32>
      %53 = arith.divf %50, %52 : vector<4x8x16xf32>
      %54 = arith.truncf %53 : vector<4x8x16xf32> to vector<4x8x16xbf16>
      %c0_41 = arith.constant 0 : index
      %c0_42 = arith.constant 0 : index
      %c0_43 = arith.constant 0 : index
      %c0_44 = arith.constant 0 : index
      %55 = vector.load %arg7[%c0_41, %c0_42, %c0_43, %c0_44] : memref<1x4x8x16xbf16, #tpu.memory_space<vmem>>, vector<1x4x8x16xbf16>
      %56 = vector.shape_cast %55 : vector<1x4x8x16xbf16> to vector<4x8x16xbf16>
      %57 = vector.shape_cast %54 : vector<4x8x16xbf16> to vector<1x4x8x16xbf16>
      tpu.vector_store %arg7[%c0_41, %c0_42, %c0_43, %c0_44], %57 {strides = array<i32>} : memref<1x4x8x16xbf16, #tpu.memory_space<vmem>>, vector<1x4x8x16xbf16>,
    } else {
    }
    return
  }
  func.func @transform_0(%arg0: i32, %arg1: i32, %arg2: memref<3xi32, #tpu.memory_space<smem>>, %arg3: memref<3xi32, #tpu.memory_space<smem>>) -> (i32, i32, i32, i32) {
    %0 = arith.index_cast %arg1 : i32 to index
    %1 = memref.load %arg2[%0] : memref<3xi32, #tpu.memory_space<smem>>
    %c0_i32 = arith.constant 0 : i32
    %c0_i32_0 = arith.constant 0 : i32
    %c0_i32_1 = arith.constant 0 : i32
    return %arg0, %c0_i32, %1, %c0_i32_0 : i32, i32, i32, i32
  }
  func.func @transform_1(%arg0: i32, %arg1: i32, %arg2: memref<3xi32, #tpu.memory_space<smem>>, %arg3: memref<3xi32, #tpu.memory_space<smem>>) -> (i32, i32, i32, i32) {
    %0 = arith.index_cast %arg1 : i32 to index
    %1 = memref.load %arg3[%0] : memref<3xi32, #tpu.memory_space<smem>>
    %c0_i32 = arith.constant 0 : i32
    %c0_i32_0 = arith.constant 0 : i32
    %c0_i32_1 = arith.constant 0 : i32
    return %arg0, %c0_i32, %1, %c0_i32_0 : i32, i32, i32, i32
  }
  func.func @transform_2(%arg0: i32, %arg1: i32, %arg2: memref<3xi32, #tpu.memory_space<smem>>, %arg3: memref<3xi32, #tpu.memory_space<smem>>) -> (i32, i32, i32, i32) {
    %0 = arith.index_cast %arg1 : i32 to index
    %1 = memref.load %arg3[%0] : memref<3xi32, #tpu.memory_space<smem>>
    %c0_i32 = arith.constant 0 : i32
    %c0_i32_0 = arith.constant 0 : i32
    %c0_i32_1 = arith.constant 0 : i32
    return %arg0, %c0_i32, %1, %c0_i32_0 : i32, i32, i32, i32
  }
  func.func @transform_3(%arg0: i32, %arg1: i32, %arg2: memref<3xi32, #tpu.memory_space<smem>>, %arg3: memref<3xi32, #tpu.memory_space<smem>>) -> (i32, i32, i32, i32) {
    %0 = arith.index_cast %arg1 : i32 to index
    %1 = memref.load %arg2[%0] : memref<3xi32, #tpu.memory_space<smem>>
    %c0_i32 = arith.constant 0 : i32
    %c0_i32_0 = arith.constant 0 : i32
    %c0_i32_1 = arith.constant 0 : i32
    return %arg0, %c0_i32, %1, %c0_i32_0 : i32, i32, i32, i32
  }
}

</mosaic_0001>

<bundles_post_ra>
// kernel: causal_mhsa_forward.3
= control target key start
LH: loop header
LB: loop body
LE: loop exit
PB: predicated region body
PF: predicated region fallthrough
CT: control target
= control target key end

     0   :  { %v200_v1 = vmov 0   ;;  %vm66_vm0 = vcmask 523264   ;;  %vm150_vm1 = vcmask 1043456   ;;  %vm151_vm2 = vcmask 523268   ;;  %s264_s1 = inlined_call_operand.vmem [shape: bf16[64,192], index: 1, kind: input, shape index: {}]   ;;  %s265_s0 = inlined_call_operand.vmem [shape: f32[32,64], index: 0, kind: input, shape index: {}]   ;;  %s266_s2 = inlined_call_operand.vmem [shape: bf16[32,192], index: 2, kind: output, shape index: {}]  }
   0x1   :  { %v188_v0 = vld [vmem:[%s264_s1 + $0x4] ss:$8 sps:$4 sm:$0xff]   ;;  %105 = vmatprep.mubr.bf16.mxu0 %v200_v1  ;;  %115 = vmatprep.mubr.bf16.mxu1 %v200_v1  ;;  %v190_v2 = vld [vmem:[%s264_s1] ss:$8 sps:$4 sm:$0xff]   ;;  %v191_v3 = vld [vmem:[%s264_s1 + $0x14] ss:$8 sps:$4 sm:$0xff]  }
   0x2   :  { %73 = vmatprep.subr.bf16.mxu0 %v188_v0  ;;  %179 = vmatprep.subr.bf16.mxu1 %v188_v0  ;;  %v193_v4 = vld [vmem:[%s264_s1 + $0x10] ss:$8 sps:$4 sm:$0xff]   ;;  %v194_v5 = vld [vmem:[%s264_s1 + $0x24] ss:$8 sps:$4 sm:$0xff]   ;;  %v196_v6 = vld [vmem:[%s264_s1 + $0x20] ss:$8 sps:$4 sm:$0xff]  }
   0x3   :  { %74 = vmatpush1.bf16.msra.mxu0 %v190_v2  ;;  %183 = vmatpush1.bf16.msra.mxu1 %v190_v2  ;;  %v197_v7 = vld [vmem:[%s264_s1 + $0x34] ss:$8 sps:$4 sm:$0xff]   ;;  %v199_v8 = vld [vmem:[%s264_s1 + $0x30] ss:$8 sps:$4 sm:$0xff]   ;;  %v12_v9 = vld [vmem:[%s265_s0] sm:$0xff] }
   0x4   :  { %75 = vmatprep.subr.bf16.mxu0 %v191_v3  ;;  %180 = vmatprep.subr.bf16.mxu1 %v191_v3  ;;  %v13_v10 = vld [vmem:[%s265_s0 + $0x8] sm:$0xff]  ;;  %v14_v11 = vld [vmem:[%s265_s0 + $0x10] sm:$0xff]  ;;  %v15_v12 = vld [vmem:[%s265_s0 + $0x18] sm:$0xff] }
   0x5   :  { %v16_v13 = vpack.c.bf16 %v13_v10, %v12_v9  ;;  %v17_v14 = vpack.c.bf16 %v15_v12, %v14_v11  ;;  %vm152_vm3 = vmor %vm151_vm2, %vm150_vm1 }
   0x7   :  { %76 = vmatpush1.bf16.msra.mxu0 %v193_v4  ;;  %184 = vmatpush1.bf16.msra.mxu1 %v193_v4 }
   0x8   :  { %77 = vmatprep.subr.bf16.mxu0 %v194_v5  ;;  %181 = vmatprep.subr.bf16.mxu1 %v194_v5 }
   0xb   :  { %78 = vmatpush1.bf16.msra.mxu0 %v196_v6  ;;  %185 = vmatpush1.bf16.msra.mxu1 %v196_v6 }
   0xc   :  { %79 = vmatprep.subr.bf16.mxu0 %v197_v7  ;;  %182 = vmatprep.subr.bf16.mxu1 %v197_v7 }
   0xf   :  { %80 = vmatpush1.bf16.msra.mxu0 %v199_v8  ;;  %186 = vmatpush1.bf16.msra.mxu1 %v199_v8 }
  0x12   :  { %169 = vmatmul.mubr.msk.bf16.vlgmr.msra.gmra.mrb[0].mxu0 %vm66_vm0, %v16_v13  ;;  %170 = vmatmul.mubr.msk.bf16.vlgmr.msra.gmra.mrb[0].mxu1 %vm66_vm0, %v17_v14 }
  0xe5   :  { %v107_v15 = vpop.f32.mrb[0].mxu0  ;;  %v117_v16 = vpop.f32.mrb[0].mxu1 }
  0xe6   :  { %v109_v17 = vpop.f32.mrb[1].mxu0  ;;  %v119_v18 = vpop.f32.mrb[1].mxu1 }
  0xe7   :  { %v175_v19 = vpack.c.bf16 %v109_v17, %v107_v15  ;;  %v177_v20 = vpack.c.bf16 %v119_v18, %v117_v16  ;;  %v111_v21 = vpop.f32.mrb[2].mxu0  ;;  %v121_v22 = vpop.f32.mrb[2].mxu1 }
  0xe8   :  { %v113_v23 = vpop.f32.mrb[3].mxu0  ;;  %v123_v24 = vpop.f32.mrb[3].mxu1 }
  0xe9   :  { %153 = vst.msk [vmem:[%s266_s2] sm:$0xff] %vm152_vm3, %v175_v19  ;;  %155 = vst.msk [vmem:[%s266_s2 + $0x10] sm:$0xff] %vm152_vm3, %v177_v20  ;;  %v176_v25 = vpack.c.bf16 %v113_v23, %v111_v21  ;;  %v178_v26 = vpack.c.bf16 %v123_v24, %v121_v22 }
  0xeb   :  { %154 = vst.msk [vmem:[%s266_s2 + $0x8] sm:$0xff] %vm152_vm3, %v176_v25  ;;  %156 = vst.msk [vmem:[%s266_s2 + $0x18] sm:$0xff] %vm152_vm3, %v178_v26 }

// kernel: causal_mhsa_forward.5
= control target key start
LH: loop header
LB: loop body
LE: loop exit
PB: predicated region body
PF: predicated region fallthrough
CT: control target
= control target key end

     0   :  { %vm59_vm0 = vcmask 523264   ;;  %s248_s0 = inlined_call_operand.vmem [shape: bf16[32,64], index: 0, kind: input, shape index: {}]   ;;  %s249_s1 = inlined_call_operand.vmem [shape: bf16[64,64], index: 1, kind: input, shape index: {}]   ;;  %s250_s2 = inlined_call_operand.hbm [shape: f32[32,64], index: 2, kind: output, shape index: {}]  }
   0x1   :  { %v164_v0 = vld [vmem:[%s249_s1] sm:$0xff]   ;;  %v165_v1 = vld [vmem:[%s249_s1 + $0x8] sm:$0xff]   ;;  %v166_v2 = vld [vmem:[%s249_s1 + $0x10] sm:$0xff]  }
   0x2   :  { %149 = vmatprep.subr.bf16.mxu0 %v164_v0  ;;  %v168_v3 = vld [vmem:[%s248_s0] sm:$0xff]  }
   0x3   :  { %150 = vmatpush3.bf16.msra.mxu0 %v164_v0  ;;  %157 = vmatprep.mubr.msk.bf16.mxu0 %vm59_vm0, %v168_v3 }
   0x4   :  { %151 = vmatprep.subr.bf16.mxu0 %v165_v1 }
   0x5   :  { %7 = vsyncpa [#allocation3], 0  ;;  %v167_v4 = vld [vmem:[%s249_s1 + $0x18] sm:$0xff]   ;;  %v169_v5 = vld [vmem:[%s248_s0 + $0x8] sm:$0xff]   ;;  %s194_s21 = smov [#allocation2]  }
   0x6   :  { %s124_s22 = sshll.u32 %s194_s21, 4  ;;  %s125_s22 = int_to_ptr.vmem [resolvable:$true] %s124_s22 }
   0x7   :  { %152 = vmatpush3.bf16.msra.mxu0 %v165_v1  ;;  %s170_s1 = scalar_lea.vmem %s125_s22, 512  ;;  %p175_p1 = scmp.lt.s32.totalorder %s125_s22, %s125_s22 }
   0x8   :  { %153 = vmatprep.subr.bf16.mxu0 %v166_v2  ;;  %p171_p0 = scmp.ne.s32.totalorder %s125_s22, %s170_s1  ;;  %p176_p2 = scmp.lt.s32.totalorder %s170_s1, %s170_s1 }
   0xa   :  { %p177_p3 = por %p176_p2, %p175_p1 }
   0xb   :  { %154 = vmatpush3.bf16.msra.mxu0 %v166_v2 }
   0xc   :  { %155 = vmatprep.subr.bf16.mxu0 %v167_v4  ;;  %p178_p4 = pnand %p177_p3, %p171_p0 }
   0xf   :  { %156 = vmatpush3.bf16.msra.mxu0 %v167_v4 }
  0x12   :  { %158 = vmatmul.mubr.msk.bf16.vlgmr.msra.gmra.mrb[0].mxu0 %vm59_vm0, %v169_v5 }
  0xe5   :  { %v159_v6 = vpop.f32.mrb[0].mxu0 }
  0xe6   :  { %117 = vst.msk [vmem:[#allocation2 + $0x10] sm:$0xff] %vm59_vm0, %v159_v6  ;;  %v100_v7 = vpop.f32.mrb[1].mxu0 }
  0xe7   :  { %115 = vst.msk [vmem:[#allocation2] sm:$0xff] %vm59_vm0, %v100_v7  ;;  %v160_v8 = vpop.f32.mrb[2].mxu0 }
  0xe8   :  { %118 = vst.msk [vmem:[#allocation2 + $0x18] sm:$0xff] %vm59_vm0, %v160_v8  ;;  %v103_v9 = vpop.f32.mrb[3].mxu0 }
  0xe9   :  { %116 = vst.msk [vmem:[#allocation2 + $0x8] sm:$0xff] %vm59_vm0, %v103_v9 }
  0xea   :  { %181 = shalt.err (!%p178_p4)
}
  0xeb   :  { %s182_s24 = scalar_lea.hbm %s250_s2, 512 }
  0xec   :  { %p183_p5 = scmp.ne.s32.totalorder %s250_s2, %s182_s24  ;;  %p186_p6 = scmp.lt.u32.totalorder %s182_s24, %s250_s2 }
  0xee   :  { %p188_p7 = pnand %p186_p6, %p183_p5 }
  0xf0   :  { %191 = shalt.err (!%p188_p7)
}
  0xf1   :  { %s195_s29 = smov 128   ;;  %s196_s30 = smov 8  }
  0xf2   :  { %130 = dma.vmem_to_hbm [thread:$0]  %s125_s22, 512, %s250_s2, [#allocation3], %s195_s29, %s195_s29, %s196_s30  }
  0xf3   :  { %192 = dma.done.wait [#allocation3], 512  }
  0xf4   :  { %193 = vsyncadd [#allocation3], 4294966784 }
  0xf5   :  { %134 = vsyncpa [#allocation3], 1 }

// kernel: causal_mhsa_forward.4
= control target key start
LH: loop header
LB: loop body
LE: loop exit
PB: predicated region body
PF: predicated region fallthrough
CT: control target
= control target key end

     0   :  { %s2731_s0 = inlined_call_operand.vmem [shape: s32[3], index: 0, kind: input, shape index: {}]   ;;  %s2732_s2 = inlined_call_operand.vmem [shape: bf16[2,4,16,16], index: 2, kind: input, shape index: {}]   ;;  %s2733_s3 = inlined_call_operand.vmem [shape: bf16[2,4,16,16], index: 3, kind: input, shape index: {}]   ;;  %s2734_s4 = inlined_call_operand.vmem [shape: bf16[2,4,16,16], index: 4, kind: input, shape index: {}]   ;;  %s2735_s5 = inlined_call_operand.vmem [shape: bf16[2,4,16,16], index: 5, kind: output, shape index: {}]   ;;  %s2736_s1 = inlined_call_operand.vmem [shape: s32[3], index: 1, kind: input, shape index: {}]  }
   0x1   :  { %2741 = sst [smem:[#allocation21_spill]] %s2732_s2  ;;  %s10_s20 = sshll.u32 %s2731_s0, 4  ;;  %s11_s20 = int_to_ptr.vmem [resolvable:$true] %s10_s20 }
   0x2   :  { %2742 = sst [smem:[#allocation22_spill]] %s2733_s3  ;;  %s14_s23 = sshll.u32 %s2736_s1, 4  ;;  %s15_s23 = int_to_ptr.vmem [resolvable:$true] %s14_s23 }
   0x3   :  { %2743 = sst [smem:[#allocation23_spill]] %s2735_s5  ;;  %s2075_s24 = scalar_lea.vmem %s11_s20, 16 }
   0x4   :  { %p2076_p0 = scmp.ne.s32.totalorder %s11_s20, %s2075_s24  ;;  %p2080_p1 = scmp.lt.s32.totalorder %s11_s20, %s11_s20 }
   0x5   :  { %p2081_p2 = scmp.lt.s32.totalorder %s2075_s24, %s2075_s24 }
   0x7   :  { %p2082_p3 = por %p2081_p2, %p2080_p1 }
   0x9   :  { %p2083_p4 = pnand %p2082_p3, %p2076_p0 }
   0xb   :  { %2086 = shalt.err (!%p2083_p4)  }
   0xc   :  { %s2205_s25 = smov [#allocation7]   ;;  %s2087_s26 = scalar_lea.vmem %s15_s23, 16 }
   0xd   :  { %13 = dma.vmem_to_smem %s11_s20, 16, %s2205_s25, [#allocation6] }
   0xe   :  { %p2088_p5 = scmp.ne.s32.totalorder %s15_s23, %s2087_s26  ;;  %p2092_p6 = scmp.lt.s32.totalorder %s15_s23, %s15_s23 }
   0xf   :  { %p2093_p7 = scmp.lt.s32.totalorder %s2087_s26, %s2087_s26 }
  0x11   :  { %p2094_p8 = por %p2093_p7, %p2092_p6 }
  0x13   :  { %p2095_p9 = pnand %p2094_p8, %p2088_p5 }
  0x15   :  { %2098 = shalt.err (!%p2095_p9)  }
  0x16   :  { %s2206_s0 = smov [#allocation8]  }
  0x17   :  { %17 = dma.vmem_to_smem %s15_s23, 16, %s2206_s0, [#allocation6] }
  0x18   :  { %2151 = dma.done.wait [#allocation6], 32 }
  0x19   :  { %2152 = vsyncadd [#allocation6], 4294967264 }
  0x1a   :  { %19 = sfence }
  0x1b   :  { %s2251_s1 = smov 0   ;;  %s2253_s27 = smov 0  }
  0x1c   :  { %s2255_s28 = smov 0   ;;  %s2257_s29 = smov 0  }
  0x1d   :  { %s2259_s30 = smov 0   ;;  %s2261_s6 = smov 0  }
  0x1e   :  { %s2263_s7 = smov 0   ;;  %s2265_s8 = smov 0  }
  0x1f   :  { %s2267_s9 = smov 0   ;;  %s2269_s10 = smov 0  }
  0x20   :  { %s2271_s11 = smov 0   ;;  %s2273_s12 = smov 0  }
  0x21   :  { %s2275_s13 = smov 0  }
  0x22 LB: > { %2744 = sst [smem:[#allocation14_spill]] %s2163_s28  ;;  %s34_s14 = sadd.s32 1, %s2195_s11  ;;  %s2203_s13 = sphi %s2275_s13, %s25_s13   ;;  %s2199_s12 = sphi %s2273_s12, %s2778_s12   ;;  %s2195_s11 = sphi %s2271_s11, %s2777_s11   ;;  %s2191_s10 = sphi %s2269_s10, %s2776_s10   ;;  %s2187_s9 = sphi %s2267_s9, %s2775_s9   ;;  %s2183_s8 = sphi %s2265_s8, %s2774_s8   ;;  %s2179_s7 = sphi %s2263_s7, %s2773_s7   ;;  %s2175_s6 = sphi %s2261_s6, %s2772_s6   ;;  %s2171_s30 = sphi %s2259_s30, %s2771_s30   ;;  %s2167_s29 = sphi %s2257_s29, %s2770_s29   ;;  %s2163_s28 = sphi %s2255_s28, %s2769_s28   ;;  %s2159_s27 = sphi %s2253_s27, %s2768_s27   ;;  %s2155_s1 = sphi %s2251_s1, %s2767_s1  }
  0x23   : > { %2745 = sst [smem:[#allocation15_spill]] %s2171_s30  ;;  %p35_p10 = scmp.ge.s32.totalorder %s34_s14, 3 }
  0x24   : > { %2746 = sst [smem:[#allocation16_spill]] %s2187_s9  ;;  %s37_s15 = sadd.s32 1, %s2199_s12 }
  0x25   : > { %2747 = sst [smem:[#allocation17_spill]] %s2191_s10  ;;  %s48_s17 = sadd.s32 1, %s2183_s8 }
  0x26   : > { %s41_s16 = sld [smem:[#allocation7 + %s2195_s11]]  ;;  %s2780_s14 = smov (%p35_p10, %s34_s14), 0 }
  0x27   : > { %s2782_s15 = smov (!%p35_p10, %s37_s15), %s2199_s12  ;;  %s42_s18 = sld [smem:[#allocation7 + %s2780_s14]] }
  0x28   : > { %p55_p11 = scmp.ne.s32.totalorder %s2183_s8, %s2179_s7  ;;  %p39_p12 = scmp.ge.s32.totalorder %s2782_s15, 2 }
  0x29   : > { %p56_p13 = scmp.eq.s32.totalorder %s2203_s13, 0  ;;  %s71_s19 = sld [smem:[#allocation8 + %s2195_s11]] }
  0x2a   : > { %s72_s20 = sld [smem:[#allocation8 + %s2780_s14]]  ;;  %s2784_s15 = smov (%p39_p12, %s2782_s15), 0 }
  0x2b   : > { %2748 = sst [smem:[#allocation18_spill]] %s2784_s15  ;;  %p2333_p0 = por %p56_p13, %p55_p11 }
  0x2c   : > { %s78_s22 = sadd.s32 1, %s2175_s6  ;;  %s43_s23 = ssub.s32 %s2199_s12, %s2784_s15 }
  0x2d   : > { %p85_p1 = scmp.ne.s32.totalorder %s2175_s6, %s2171_s30  ;;  %s44_s24 = ssub.s32 %s41_s16, %s42_s18 }
  0x2e   : > { %s101_s25 = sld [smem:[#allocation8 + %s2195_s11]]  ;;  %s45_s26 = sor.u32 %s44_s24, %s43_s23 }
  0x2f   : > { %p2345_p2 = por %p85_p1, %p56_p13  ;;  %p46_p3 = scmp.eq.s32.totalorder %s45_s26, 0 }
  0x30   : > { %s74_s5 = ssub.s32 %s71_s19, %s72_s20  ;;  %s102_s9 = sld [smem:[#allocation8 + %s2780_s14]] }
  0x31   : > { %s75_s10 = sor.u32 %s74_s5, %s43_s23  ;;  %s1738_s30 = sadd.s32 4294967295, %s2203_s13  }
  0x32   : > { %s2351_s15 = scalar_select %p46_p3, %s2183_s8, %s48_s17  }
  0x33   : > { %p76_p4 = scmp.eq.s32.totalorder %s75_s10, 0  ;;  %p115_p5 = scmp.ne.s32.totalorder %s2167_s29, %s2163_s28 }
  0x34   : > { %2751 = sst [smem:[#allocation19_spill]] %s2351_s15  ;;  %s108_s5 = sadd.s32 1, %s2167_s29 }
  0x35   : > { %s131_s16 = sld [smem:[#allocation7 + %s2195_s11]]  ;;  %p2362_p6 = por %p115_p5, %p56_p13 }
  0x36   : > { %s2358_s18 = scalar_select %p76_p4, %s2175_s6, %s78_s22  }
  0x37   : > { %s132_s26 = sld [smem:[#allocation7 + %s2780_s14]]  ;;  %s104_s19 = ssub.s32 %s101_s25, %s102_s9 }
  0x38   : > { %2752 = sst [smem:[#allocation20_spill]] %s2358_s18  ;;  %s105_s20 = sor.u32 %s104_s19, %s43_s23 }
  0x39   : > { %p148_p7 = scmp.ne.s32.totalorder %s2159_s27, %s2155_s1  ;;  %p106_p8 = scmp.eq.s32.totalorder %s105_s20, 0 }
  0x3a   : > { %p149_p9 = scmp.eq.s32.totalorder %s1738_s30, 5  ;;  %s138_s18 = sadd.s32 1, %s2159_s27 }
  0x3b   : > { %s2371_s17 = scalar_select %p106_p8, %s2167_s29, %s108_s5  }
  0x3c   : > { %p2373_p10 = por %p149_p9, %p148_p7  ;;  %p1741_p12 = scmp.ge.s32.totalorder %s2203_s13, 6 }
  0x3d   : > { %s134_s10 = ssub.s32 %s131_s16, %s132_s26 }
  0x3e   : > { %s135_s22 = sor.u32 %s134_s10, %s43_s23  ;;  %171 = sbr.rel (%p1741_p12) target bundleno = 105 (0x69), region = 16 }
  0x3f   : > { %p136_p11 = scmp.eq.s32.totalorder %s135_s22, 0 }
  0x41   : > { %s2379_s28 = scalar_select %p136_p11, %s2159_s27, %s138_s18  }
  0x45   : > { %174 = sbr.rel (!%p2333_p0) target bundleno = 81 (0x51), region = 20  ;;  %s179_s30 = sld [smem:[#allocation7 + %s2195_s11]] (%p2333_p0) }
  0x46   : > { %s176_s9 = sand.u32 (%p2333_p0), 1, %s2183_s8   ;;  %s1743_s25 = sshll.u32 (%p2333_p0), %s2199_s12, 3 }
  0x47   : > { %s1742_s16 = sshll.u32 (%p2333_p0), %s176_s9, 4  ;;  %s2755_s2 = sld [smem:[#allocation21_spill]] (%p2333_p0) }
  0x48   : > { %s178_s20 = scalar_lea.vmem (%p2333_p0), [#allocation9], %s1742_s16 }
  0x4b   : > { %s181_s26 = sadd.s32 (%p2333_p0), %s1743_s25, %s179_s30 }
  0x4c   : > { %s1744_s19 = sshll.u32 %s181_s26, 2 }
  0x4d   : > { %s183_s18 = scalar_lea.vmem %s2755_s2, %s1744_s19 }
  0x4e   : > { %v199_v0 = vld [vmem:[%s183_s18] sm:$0xf]  ;;  %v201_v1 = vld [vmem:[%s183_s18 + $0x8] sm:$0xf]  ;;  %v203_v2 = vld [vmem:[%s183_s18 + $0x10] sm:$0xf] }
  0x4f   : > { %200 = vst [vmem:[%s178_s20] sm:$0xf] %v199_v0  ;;  %202 = vst [vmem:[%s178_s20 + $0x4] sm:$0xf] %v201_v1  ;;  %v205_v3 = vld [vmem:[%s183_s18 + $0x18] sm:$0xf] }
  0x50   : > { %204 = vst [vmem:[%s178_s20 + $0x8] sm:$0xf] %v203_v2  ;;  %206 = vst [vmem:[%s178_s20 + $0xc] sm:$0xf] %v205_v3 }
  0x51 PF: > { %237 = sbr.rel (!%p2345_p2) target bundleno = 93 (0x5d), region = 61  ;;  %s242_s21 = sld [smem:[#allocation8 + %s2195_s11]] (%p2345_p2) }
  0x52   : > { %s239_s10 = sand.u32 (%p2345_p2), 1, %s2175_s6   ;;  %s1746_s22 = sshll.u32 (%p2345_p2), %s2199_s12, 3 }
  0x53   : > { %s1745_s30 = sshll.u32 (%p2345_p2), %s239_s10, 4  ;;  %s2756_s3 = sld [smem:[#allocation22_spill]] (%p2345_p2) }
  0x54   : > { %s241_s23 = scalar_lea.vmem (%p2345_p2), [#allocation10], %s1745_s30 }
  0x57   : > { %s244_s9 = sadd.s32 (%p2345_p2), %s1746_s22, %s242_s21 }
  0x58   : > { %s1747_s25 = sshll.u32 %s244_s9, 2 }
  0x59   : > { %s246_s19 = scalar_lea.vmem %s2756_s3, %s1747_s25 }
  0x5a   : > { %v262_v4 = vld [vmem:[%s246_s19] sm:$0xf]  ;;  %v264_v5 = vld [vmem:[%s246_s19 + $0x8] sm:$0xf]  ;;  %v266_v6 = vld [vmem:[%s246_s19 + $0x10] sm:$0xf] }
  0x5b   : > { %263 = vst [vmem:[%s241_s23] sm:$0xf] %v262_v4  ;;  %265 = vst [vmem:[%s241_s23 + $0x4] sm:$0xf] %v264_v5  ;;  %v268_v7 = vld [vmem:[%s246_s19 + $0x18] sm:$0xf] }
  0x5c   : > { %267 = vst [vmem:[%s241_s23 + $0x8] sm:$0xf] %v266_v6  ;;  %269 = vst [vmem:[%s241_s23 + $0xc] sm:$0xf] %v268_v7 }
  0x5d PF: > { %300 = sbr.rel (!%p2362_p6) target bundleno = 105 (0x69), region = 102  ;;  %s305_s0 = sld [smem:[#allocation8 + %s2195_s11]] (%p2362_p6) }
  0x5e   : > { %s302_s5 = sand.u32 (%p2362_p6), 1, %s2167_s29   ;;  %s1749_s18 = sshll.u32 (%p2362_p6), %s2199_s12, 3 }
  0x5f   : > { %s1748_s20 = sshll.u32 (%p2362_p6), %s302_s5, 4 }
  0x60   : > { %s304_s25 = scalar_lea.vmem (%p2362_p6), [#allocation11], %s1748_s20 }
  0x63   : > { %s307_s21 = sadd.s32 (%p2362_p6), %s1749_s18, %s305_s0 }
  0x64   : > { %s1750_s10 = sshll.u32 %s307_s21, 2 }
  0x65   : > { %s309_s9 = scalar_lea.vmem %s2734_s4, %s1750_s10 }
  0x66   : > { %v325_v8 = vld [vmem:[%s309_s9] sm:$0xf]  ;;  %v327_v9 = vld [vmem:[%s309_s9 + $0x8] sm:$0xf]  ;;  %v329_v10 = vld [vmem:[%s309_s9 + $0x10] sm:$0xf] }
  0x67   : > { %326 = vst [vmem:[%s304_s25] sm:$0xf] %v325_v8  ;;  %328 = vst [vmem:[%s304_s25 + $0x4] sm:$0xf] %v327_v9  ;;  %v331_v11 = vld [vmem:[%s309_s9 + $0x18] sm:$0xf] }
  0x68   : > { %330 = vst [vmem:[%s304_s25 + $0x8] sm:$0xf] %v329_v10  ;;  %332 = vst [vmem:[%s304_s25 + $0xc] sm:$0xf] %v331_v11 }
  0x69 PF: > { %p1751_p13 = scmp.ge.s32.totalorder %s2203_s13, 1  ;;  %p362_p0 = scmp.lt.s32.totalorder %s2203_s13, 7 }
  0x6b   : > { %p363_p1 = pnand %p1751_p13, %p362_p0 }
  0x6c   : > { %s2757_s24 = sld [smem:[#allocation15_spill]] (!%p363_p1)  ;;  %s2758_s26 = sld [smem:[#allocation14_spill]] (!%p363_p1) }
  0x6d   : > { %366 = sbr.rel (%p363_p1) target bundleno = 1709 (0x6ad), region = 143  ;;  %s2759_s16 = sld [smem:[#allocation16_spill]] (!%p363_p1) }
  0x6e   : > { %s369_s19 = sand.u32 (!%p363_p1), 1, %s2179_s7   ;;  %s410_s20 = sand.u32 (!%p363_p1), 1, %s2155_s1  }
  0x6f   : > { %s1752_s0 = sshll.u32 (!%p363_p1), %s369_s19, 4  ;;  %s1755_s10 = sshll.u32 (!%p363_p1), %s410_s20, 4 }
  0x70   : > { %s371_s9 = scalar_lea.vmem (!%p363_p1), [#allocation9], %s1752_s0  ;;  %s2422_s3 = scalar_lea.vmem (!%p363_p1), [#allocation12], %s1755_s10 }
  0x72   : > { %s376_s23 = sand.u32 (!%p363_p1), 1, %s2757_s24   ;;  %s383_s18 = sand.u32 (!%p363_p1), 1, %s2758_s26  }
  0x73   : > { %s1753_s5 = sshll.u32 (!%p363_p1), %s376_s23, 4  ;;  %s1754_s21 = sshll.u32 (!%p363_p1), %s383_s18, 4 }
  0x74   : > { %s2413_s22 = sld [smem:[#allocation7 + %s2759_s16]]  ;;  %s2418_s25 = scalar_lea.vmem [#allocation10], %s1753_s5 }
  0x75   : > { %s2416_s30 = sld [smem:[#allocation8 + %s2759_s16]]  ;;  %s2420_s2 = scalar_lea.vmem [#allocation11], %s1754_s21 }
  0x7b   : > { %p1756_p2 = scmp.ne.s32.totalorder %s2416_s30, 0 }
  0x7c   : > { %v1781_v12 = vld [vmem:[%s371_s9] sm:$0xff] (!%p1756_p2)   ;;  %v1788_v13 = vld [vmem:[%s371_s9 + $0x8] sm:$0xff] (!%p1756_p2)   ;;  %vm445_vm0 = vcmask (!%p1756_p2), 7168   ;;  %v2207_v18 = vmov (!%p1756_p2), -inf   ;;  %v2208_v19 = vmov (!%p1756_p2), 0.0   ;;  %vm454_vm1 = vcmask (!%p1756_p2), 130048  }
  0x7d   : > { %423 = sbr.rel (%p1756_p2) target bundleno = 133 (0x85), region = 159  ;;  %v1782_v14 = vunpack.c.l.bf16 (!%p1756_p2), %v1781_v12  ;;  %v1783_v15 = vunpack.c.h.bf16 (!%p1756_p2), %v1781_v12  ;;  %v1786_v16 = vunpack.c.l.bf16 (!%p1756_p2), %v1788_v13  ;;  %v1787_v17 = vunpack.c.h.bf16 (!%p1756_p2), %v1788_v13  ;;  %446 = vst.msk [vmem:[#allocation3] sm:$0xff] (!%p1756_p2), %vm445_vm0, %v2207_v18  ;;  %447 = vst.msk [vmem:[#allocation3 + $0x8] sm:$0xff] (!%p1756_p2), %vm445_vm0, %v2207_v18 }
  0x7e   : > { %448 = vst.msk [vmem:[#allocation3 + $0x10] sm:$0xff] (!%p1756_p2), %vm445_vm0, %v2207_v18  ;;  %449 = vst.msk [vmem:[#allocation3 + $0x18] sm:$0xff] (!%p1756_p2), %vm445_vm0, %v2207_v18  ;;  %vm440_vm2 = vcmask (!%p1756_p2), 125952  }
  0x7f   : > { %450 = vst.msk [vmem:[#allocation4] sm:$0xff] (!%p1756_p2), %vm445_vm0, %v2208_v19  ;;  %451 = vst.msk [vmem:[#allocation4 + $0x8] sm:$0xff] (!%p1756_p2), %vm445_vm0, %v2208_v19  ;;  %v432_v20 = vmul.f32 (!%p1756_p2), 0.25, %v1782_v14  ;;  %v433_v21 = vmul.f32 (!%p1756_p2), 0.25, %v1783_v15  ;;  %v434_v22 = vmul.f32 (!%p1756_p2), 0.25, %v1786_v16  ;;  %v435_v23 = vmul.f32 (!%p1756_p2), 0.25, %v1787_v17 }
  0x80   : > { %452 = vst.msk [vmem:[#allocation4 + $0x10] sm:$0xff] (!%p1756_p2), %vm445_vm0, %v2208_v19  ;;  %453 = vst.msk [vmem:[#allocation4 + $0x18] sm:$0xff] (!%p1756_p2), %vm445_vm0, %v2208_v19 }
  0x81   : > { %455 = vst.msk [vmem:[#allocation5] sm:$0xff] (!%p1756_p2), %vm454_vm1, %v2208_v19  ;;  %456 = vst.msk [vmem:[#allocation5 + $0x8] sm:$0xff] (!%p1756_p2), %vm454_vm1, %v2208_v19  ;;  %v436_v24 = vpack.c.bf16 (!%p1756_p2), %v432_v20, %v432_v20  ;;  %v437_v25 = vpack.c.bf16 (!%p1756_p2), %v433_v21, %v433_v21  ;;  %v438_v26 = vpack.c.bf16 (!%p1756_p2), %v434_v22, %v434_v22 }
  0x82   : > { %457 = vst.msk [vmem:[#allocation5 + $0x10] sm:$0xff] (!%p1756_p2), %vm454_vm1, %v2208_v19  ;;  %458 = vst.msk [vmem:[#allocation5 + $0x18] sm:$0xff] (!%p1756_p2), %vm454_vm1, %v2208_v19  ;;  %v439_v27 = vpack.c.bf16 (!%p1756_p2), %v435_v23, %v435_v23 }
  0x83   : > { %441 = vst.msk [vmem:[#allocation2] sm:$0xf] (!%p1756_p2), %vm440_vm2, %v436_v24  ;;  %442 = vst.msk [vmem:[#allocation2 + $0x4] sm:$0xf] (!%p1756_p2), %vm440_vm2, %v437_v25 }
  0x84   : > { %443 = vst.msk [vmem:[#allocation2 + $0x8] sm:$0xf] %vm440_vm2, %v438_v26  ;;  %444 = vst.msk [vmem:[#allocation2 + $0xc] sm:$0xf] %vm440_vm2, %v439_v27 }
  0x85 PF: > { %p1757_p3 = scmp.ge.s32.totalorder %s2416_s30, %s2413_s22 }
  0x86   : > { %v467_v28 = vld [vmem:[%s2418_s25] sm:$0xf] (!%p1757_p3)  ;;  %vm475_vm3 = vcmask (!%p1757_p3), 130048   ;;  %v468_v29 = vld [vmem:[%s2418_s25 + $0x4] sm:$0xf] (!%p1757_p3)  ;;  %v2209_v30 = vmov (!%p1757_p3), 0.0  }
  0x87   : > { %462 = sbr.rel (%p1757_p3) target bundleno = 872 (0x368), region = 163  ;;  %1821 = vmatprep.subr.bf16.mxu0 (!%p1757_p3), %v2209_v30  ;;  %v480_v31 = vsel (!%p1757_p3), %vm475_vm3, %v467_v28, 0  ;;  %1827 = vmatprep.subr.bf16.mxu1 (!%p1757_p3), %v2209_v30  ;;  %v526_v32 = vsel (!%p1757_p3), %vm475_vm3, %v468_v29, 0  ;;  %vm2210_vm4 = vmmov (!%p1757_p3), 0   ;;  %v469_v33 = vld [vmem:[%s2418_s25 + $0x8] sm:$0xf] (!%p1757_p3) }
  0x88   : > { %1822 = vmatpush3.bf16.xpose.msra.mxu0 (!%p1757_p3), %v480_v31  ;;  %1828 = vmatpush3.bf16.xpose.msra.mxu1 (!%p1757_p3), %v526_v32  ;;  %v470_v34 = vld [vmem:[%s2418_s25 + $0xc] sm:$0xf] (!%p1757_p3)  ;;  %v572_v37 = vsel (!%p1757_p3), %vm475_vm3, %v469_v33, 0  ;;  %vm664_vm5 = vcmask (!%p1757_p3), 64512   ;;  %v2211_v61 = vmov (!%p1757_p3), 0   ;;  %v660_v62 = vld [vmem:[#allocation3] sm:$0xff] (!%p1757_p3) }
  0x89   : > { %1823 = vmatprep.mubr.msk.bf16.mxu0 (!%p1757_p3), %vm2210_vm4, %v2209_v30  ;;  %1833 = vmatprep.subr.bf16.mxu0 (!%p1757_p3), %v2209_v30  ;;  %v618_v38 = vsel (!%p1757_p3), %vm475_vm3, %v470_v34, 0  ;;  %vm749_vm6 = vcmask (!%p1757_p3), 7168   ;;  %v2473_v1 = vld [vmem:[#allocation3 + $0x8] sm:$0xff] (!%p1757_p3)  ;;  %v662_v6 = vld [vmem:[#allocation3 + $0x10] sm:$0xff] (!%p1757_p3)  ;;  %v2484_v10 = vld [vmem:[#allocation3 + $0x18] sm:$0xff] (!%p1757_p3)  ;;  %vm789_vm7 = vcmask (!%p1757_p3), 1043456  }
  0x8a   : > { %1829 = vmatprep.mubr.msk.bf16.mxu1 (!%p1757_p3), %vm2210_vm4, %v2209_v30  ;;  %1839 = vmatprep.subr.bf16.mxu1 (!%p1757_p3), %v2209_v30  ;;  %v471_v15 = vld [vmem:[%s2420_s2] sm:$0xf] (!%p1757_p3)  ;;  %v472_v18 = vld [vmem:[%s2420_s2 + $0x4] sm:$0xf] (!%p1757_p3)  ;;  %v473_v32 = vld [vmem:[%s2420_s2 + $0x8] sm:$0xf] (!%p1757_p3) }
  0x8b   : > { %v463_v35 = vld [vmem:[#allocation2] sm:$0xf] (!%p1757_p3)  ;;  %v464_v36 = vld [vmem:[#allocation2 + $0x4] sm:$0xf] (!%p1757_p3)  ;;  %v465_v39 = vld [vmem:[#allocation2 + $0x8] sm:$0xf] (!%p1757_p3)  ;;  %2031 = vset.pattern.permute.xlu0 (!%p1757_p3), %v2211_v61  ;;  %2032 = vset.pattern.permute.xlu1 (!%p1757_p3), %v2211_v61 }
  0x8c   : > { %v466_v40 = vld [vmem:[#allocation2 + $0xc] sm:$0xf] (!%p1757_p3)  ;;  %v791_v16 = vsel (!%p1757_p3), %vm789_vm7, %v471_v15, 0  ;;  %v837_v19 = vsel (!%p1757_p3), %vm789_vm7, %v472_v18, 0  ;;  %v756_v18 = vld [vmem:[#allocation5 + $0x10] sm:$0xff] (!%p1757_p3) }
  0x8f   : > { %1824 = vmatmul.mubr.msk.bf16.vlgmr.msra.gmra.mrb[0].mxu0 %vm475_vm3, %v463_v35  ;;  %1830 = vmatmul.mubr.msk.bf16.vlgmr.msra.gmra.mrb[0].mxu1 %vm475_vm3, %v464_v36 }
  0x90   : > { %1834 = vmatpush3.bf16.xpose.msra.mxu0 %v572_v37  ;;  %1840 = vmatpush3.bf16.xpose.msra.mxu1 %v618_v38  ;;  %v883_v37 = vsel %vm789_vm7, %v473_v32, 0  ;;  %v474_v38 = vld [vmem:[%s2420_s2 + $0xc] sm:$0xf] }
  0x91   : > { %1835 = vmatprep.mubr.msk.bf16.mxu0 %vm2210_vm4, %v2209_v30  ;;  %1841 = vmatprep.mubr.msk.bf16.mxu1 %vm2210_vm4, %v2209_v30 }
  0x92   : > { %1845 = vmatprep.subr.bf16.mxu0 %v2209_v30  ;;  %1851 = vmatprep.subr.bf16.mxu1 %v2209_v30 }
  0x97   : > { %1836 = vmatmul.mubr.msk.bf16.vlgmr.msra.gmra.mrb[4].mxu0 %vm475_vm3, %v465_v39  ;;  %1842 = vmatmul.mubr.msk.bf16.vlgmr.msra.gmra.mrb[4].mxu1 %vm475_vm3, %v466_v40 }
  0x98   : > { %1847 = vmatprep.mubr.msk.bf16.mxu0 %vm2210_vm4, %v2209_v30  ;;  %1853 = vmatprep.mubr.msk.bf16.mxu1 %vm2210_vm4, %v2209_v30 }
  0x99   : > { %1846 = vmatpush3.bf16.msra.mxu0 %v791_v16  ;;  %1852 = vmatpush3.bf16.msra.mxu1 %v837_v19 }
  0x9a   : > { %1857 = vmatprep.subr.bf16.mxu0 %v2209_v30  ;;  %1863 = vmatprep.subr.bf16.mxu1 %v2209_v30 }
 0x162   : > { %v2457_v41 = vpop.f32.mrb[0].mxu0  ;;  %v2459_v42 = vpop.f32.mrb[0].mxu1 }
 0x163   : > { %v1825_v43 = vpop.f32.mrb[1].mxu0  ;;  %v665_v44 = vsel %vm664_vm5, %v2457_v41, -inf  ;;  %v1831_v45 = vpop.f32.mrb[1].mxu1  ;;  %v668_v50 = vsel %vm664_vm5, %v2459_v42, -inf }
 0x164   : > { %666 = vmax.xlane.f32.xlu0 %v665_v44  ;;  %v519_v46 = vpop.f32.mrb[2].mxu0  ;;  %v565_v47 = vpop.f32.mrb[2].mxu1  ;;  %v929_v43 = vsel %vm789_vm7, %v474_v38, 0 }
 0x165   : > { %v1826_v48 = vpop.f32.mrb[3].mxu0  ;;  %v1832_v49 = vpop.f32.mrb[3].mxu1 }
 0x168   : > { %669 = vmax.xlane.f32.xlu0 %v668_v50 }
 0x16a   : > { %v2465_v51 = vpop.f32.mrb[4].mxu0  ;;  %v2467_v52 = vpop.f32.mrb[4].mxu1 }
 0x16b   : > { %v1837_v53 = vpop.f32.mrb[5].mxu0  ;;  %v671_v54 = vsel %vm664_vm5, %v2465_v51, -inf  ;;  %v1843_v55 = vpop.f32.mrb[5].mxu1  ;;  %v674_v60 = vsel %vm664_vm5, %v2467_v52, -inf }
 0x16c   : > { %672 = vmax.xlane.f32.xlu1 %v671_v54  ;;  %v611_v56 = vpop.f32.mrb[6].mxu0  ;;  %v657_v57 = vpop.f32.mrb[6].mxu1  ;;  %v725_v55 = vld [vmem:[#allocation4] sm:$0xff] }
 0x16d   : > { %v1838_v58 = vpop.f32.mrb[7].mxu0  ;;  %v1844_v59 = vpop.f32.mrb[7].mxu1 }
 0x16e   : > { %v726_v58 = vld [vmem:[#allocation4 + $0x8] sm:$0xff] }
 0x170   : > { %675 = vmax.xlane.f32.xlu1 %v674_v60 }
 0x1f1   : > { %v667_v63 = vpop.xlane.xlu0 %666 }
 0x1f2   : > { %v677_v0 = vmax.f32 %v660_v62, %v667_v63 }
 0x1f4   : > { %v681_v2 = vsub.f32 %v660_v62, %v677_v0  ;;  %979 = vst.msk [vmem:[#allocation3] sm:$0xff] %vm749_vm6, %v677_v0  ;;  %695 = vperm.xlu0 %2031, %v677_v0   ;;  %v727_v0 = vld [vmem:[#allocation4 + $0x10] sm:$0xff] }
 0x1f5   : > { %v670_v3 = vpop.xlane.xlu0 %669 }
 0x1f6   : > { %v685_v4 = vmul.f32 1.442695, %v681_v2  ;;  %v2477_v5 = vmax.f32 %v2473_v1, %v670_v3  ;;  %v728_v3 = vld [vmem:[#allocation4 + $0x18] sm:$0xff] }
 0x1f8   : > { %2033 = vpow2.f32 %v685_v4  ;;  %v682_v7 = vsub.f32 %v2473_v1, %v2477_v5  ;;  %980 = vst.msk [vmem:[#allocation3 + $0x8] sm:$0xff] %vm749_vm6, %v2477_v5  ;;  %700 = vperm.xlu1 %2032, %v2477_v5  }
 0x1f9   : > { %v673_v8 = vpop.xlane.xlu1 %672 }
 0x1fa   : > { %v679_v9 = vmax.f32 %v662_v6, %v673_v8  ;;  %v687_v47 = vmul.f32 1.442695, %v682_v7  ;;  %v754_v8 = vld [vmem:[#allocation5] sm:$0xff] }
 0x1fc   : > { %v683_v11 = vsub.f32 %v662_v6, %v679_v9  ;;  %981 = vst.msk [vmem:[#allocation3 + $0x10] sm:$0xff] %vm749_vm6, %v679_v9  ;;  %705 = vperm.xlu1 %2032, %v679_v9  }
 0x1fd   : > { %v676_v12 = vpop.xlane.xlu1 %675 }
 0x1fe   : > { %v2488_v13 = vmax.f32 %v2484_v10, %v676_v12  ;;  %v689_v40 = vmul.f32 1.442695, %v683_v11 }
 0x200   : > { %v684_v14 = vsub.f32 %v2484_v10, %v2488_v13  ;;  %982 = vst.msk [vmem:[#allocation3 + $0x18] sm:$0xff] %vm749_vm6, %v2488_v13  ;;  %710 = vperm.xlu1 %2032, %v2488_v13   ;;  %v755_v10 = vld [vmem:[#allocation5 + $0x8] sm:$0xff] }
 0x202   : > { %v2497_v17 = vpop.eup %2033 }
 0x203   : > { %v729_v56 = vmul.f32 %v2497_v17, %v725_v55 }
 0x204   : > { %760 = vperm.xlu1 %2032, %v2497_v17  }
 0x273   : > { %v696_v20 = vpop.permute.xlu0 %695 }
 0x274   : > { %v713_v21 = vsub.f32 %v2457_v41, %v696_v20 }
 0x276   : > { %v717_v22 = vmul.f32 1.442695, %v713_v21 }
 0x277   : > { %v701_v23 = vpop.permute.xlu1 %700 }
 0x278   : > { %2035 = vpow2.f32 %v717_v22  ;;  %v714_v24 = vsub.f32 %v2459_v42, %v701_v23 }
 0x27a   : > { %v719_v25 = vmul.f32 1.442695, %v714_v24 }
 0x27b   : > { %v706_v26 = vpop.permute.xlu1 %705 }
 0x27c   : > { %2037 = vpow2.f32 %v719_v25  ;;  %v715_v27 = vsub.f32 %v2465_v51, %v706_v26  ;;  %v757_v25 = vld [vmem:[#allocation5 + $0x18] sm:$0xff] }
 0x27e   : > { %v721_v28 = vmul.f32 1.442695, %v715_v27 }
 0x27f   : > { %v711_v29 = vpop.permute.xlu1 %710 }
 0x280   : > { %2039 = vpow2.f32 %v721_v28  ;;  %v716_v31 = vsub.f32 %v2467_v52, %v711_v29  ;;  %v691_v52 = vmul.f32 1.442695, %v684_v14 }
 0x282   : > { %v2036_v33 = vpop.eup %2035  ;;  %v723_v34 = vmul.f32 1.442695, %v716_v31 }
 0x283   : > { %v733_v35 = vsel %vm664_vm5, %v2036_v33, 0.0  ;;  %v782_v36 = vpack.c.bf16 %v2036_v33, %v2036_v33  ;;  %v761_v54 = vpop.permute.xlu1 %760 }
 0x284   : > { %2041 = vpow2.f32 %v723_v34  ;;  %734 = vadd.xlane.f32.xlu1 %v733_v35  ;;  %v778_v9 = vmul.f32 %v761_v54, %v754_v8 }
 0x285   : > { %1848 = vmatmul.mubr.msk.bf16.vlgmr.msra.gmra.mrb[8].mxu0 %vm664_vm5, %v782_v36  ;;  %2043 = vpow2.f32 %v689_v40 }
 0x286   : > { %v2038_v39 = vpop.eup %2037  ;;  %1858 = vmatpush3.bf16.msra.mxu0 %v883_v37  ;;  %1859 = vmatprep.mubr.msk.bf16.mxu0 %vm2210_vm4, %v2209_v30  ;;  %2045 = vpow2.f32 %v687_v47 }
 0x287   : > { %v736_v41 = vsel %vm664_vm5, %v2038_v39, 0.0  ;;  %v783_v42 = vpack.c.bf16 %v2038_v39, %v2038_v39  ;;  %2047 = vpow2.f32 %v691_v52 }
 0x288   : > { %737 = vadd.xlane.f32.xlu0 %v736_v41 }
 0x289   : > { %1854 = vmatmul.mubr.msk.bf16.vlgmr.msra.gmra.mrb[8].mxu1 %vm664_vm5, %v783_v42 }
 0x28a   : > { %v2040_v44 = vpop.eup %2039  ;;  %1864 = vmatpush3.bf16.msra.mxu1 %v929_v43  ;;  %1865 = vmatprep.mubr.msk.bf16.mxu1 %vm2210_vm4, %v2209_v30 }
 0x28b   : > { %v784_v45 = vpack.c.bf16 %v2040_v44, %v2040_v44  ;;  %v739_v51 = vsel %vm664_vm5, %v2040_v44, 0.0 }
 0x28d   : > { %1860 = vmatmul.mubr.msk.bf16.vlgmr.msra.gmra.mrb[12].mxu0 %vm664_vm5, %v784_v45 }
 0x28e   : > { %v2042_v46 = vpop.eup %2041 }
 0x28f   : > { %v785_v48 = vpack.c.bf16 %v2042_v46, %v2042_v46  ;;  %v2044_v49 = vpop.eup %2043  ;;  %v742_v30 = vsel %vm664_vm5, %v2042_v46, 0.0 }
 0x290   : > { %v2046_v50 = vpop.eup %2045  ;;  %v731_v1 = vmul.f32 %v2044_v49, %v727_v0 }
 0x291   : > { %1866 = vmatmul.mubr.msk.bf16.vlgmr.msra.gmra.mrb[12].mxu1 %vm664_vm5, %v785_v48  ;;  %v2048_v53 = vpop.eup %2047  ;;  %v730_v60 = vmul.f32 %v2046_v50, %v726_v58 }
 0x292   : > { %v732_v5 = vmul.f32 %v2048_v53, %v728_v3 }
 0x295   : > { %770 = vperm.xlu1 %2032, %v2044_v49  }
 0x29e   : > { %765 = vperm.xlu0 %2031, %v2046_v50  }
 0x2b9   : > { %740 = vadd.xlane.f32.xlu1 %v739_v51 }
 0x2bd   : > { %743 = vadd.xlane.f32.xlu1 %v742_v30 }
 0x2ce   : > { %775 = vperm.xlu1 %2032, %v2048_v53  }
 0x311   : > { %v735_v57 = vpop.xlane.xlu1 %734 }
 0x312   : > { %v745_v59 = vadd.f32 %v735_v57, %v729_v56 }
 0x314   : > { %750 = vst.msk [vmem:[#allocation4] sm:$0xff] %vm749_vm6, %v745_v59 }
 0x315   : > { %v738_v61 = vpop.xlane.xlu0 %737  ;;  %v771_v63 = vpop.permute.xlu1 %770 }
 0x316   : > { %v746_v62 = vadd.f32 %v738_v61, %v730_v60  ;;  %v780_v23 = vmul.f32 %v771_v63, %v756_v18 }
 0x318   : > { %751 = vst.msk [vmem:[#allocation4 + $0x8] sm:$0xff] %vm749_vm6, %v746_v62 }
 0x31d   : > { %v766_v11 = vpop.permute.xlu0 %765 }
 0x31e   : > { %v779_v16 = vmul.f32 %v766_v11, %v755_v10 }
 0x346   : > { %v741_v2 = vpop.xlane.xlu1 %740 }
 0x347   : > { %v747_v4 = vadd.f32 %v741_v2, %v731_v1 }
 0x349   : > { %752 = vst.msk [vmem:[#allocation4 + $0x10] sm:$0xff] %vm749_vm6, %v747_v4 }
 0x34a   : > { %v744_v6 = vpop.xlane.xlu1 %743 }
 0x34b   : > { %v748_v7 = vadd.f32 %v744_v6, %v732_v5 }
 0x34d   : > { %753 = vst.msk [vmem:[#allocation4 + $0x18] sm:$0xff] %vm749_vm6, %v748_v7 }
 0x34e   : > { %v776_v26 = vpop.permute.xlu1 %775 }
 0x34f   : > { %v781_v32 = vmul.f32 %v776_v26, %v757_v25 }
 0x358   : > { %v827_v12 = vpop.f32.mrb[8].mxu0 }
 0x359   : > { %v971_v13 = vadd.f32 %v827_v12, %v778_v9  ;;  %v1849_v14 = vpop.f32.mrb[9].mxu0 }
 0x35a   : > { %v830_v15 = vpop.f32.mrb[10].mxu0 }
 0x35b   : > { %975 = vst.msk [vmem:[#allocation5] sm:$0xff] %vm475_vm3, %v971_v13  ;;  %v1850_v17 = vpop.f32.mrb[11].mxu0 }
 0x35c   : > { %v873_v19 = vpop.f32.mrb[8].mxu1 }
 0x35d   : > { %v972_v20 = vadd.f32 %v873_v19, %v779_v16  ;;  %v1855_v21 = vpop.f32.mrb[9].mxu1 }
 0x35e   : > { %v876_v22 = vpop.f32.mrb[10].mxu1 }
 0x35f   : > { %976 = vst.msk [vmem:[#allocation5 + $0x8] sm:$0xff] %vm475_vm3, %v972_v20  ;;  %v1856_v24 = vpop.f32.mrb[11].mxu1 }
 0x360   : > { %v919_v27 = vpop.f32.mrb[12].mxu0 }
 0x361   : > { %v973_v28 = vadd.f32 %v919_v27, %v780_v23  ;;  %v1861_v29 = vpop.f32.mrb[13].mxu0 }
 0x362   : > { %v922_v31 = vpop.f32.mrb[14].mxu0 }
 0x363   : > { %977 = vst.msk [vmem:[#allocation5 + $0x10] sm:$0xff] %vm475_vm3, %v973_v28  ;;  %v1862_v33 = vpop.f32.mrb[15].mxu0 }
 0x364   : > { %v965_v34 = vpop.f32.mrb[12].mxu1 }
 0x365   : > { %v974_v35 = vadd.f32 %v965_v34, %v781_v32  ;;  %v1867_v36 = vpop.f32.mrb[13].mxu1 }
 0x366   : > { %v968_v37 = vpop.f32.mrb[14].mxu1 }
 0x367   : > { %978 = vst.msk [vmem:[#allocation5 + $0x18] sm:$0xff] %vm475_vm3, %v974_v35  ;;  %v1868_v38 = vpop.f32.mrb[15].mxu1 }
 0x368 PF: > { %p1766_p4 = scmp.ne.s32.totalorder %s2416_s30, %s2413_s22 }
 0x369   : > { %v991_v39 = vld [vmem:[%s2418_s25] sm:$0xf] (!%p1766_p4)  ;;  %vm999_vm8 = vcmask (!%p1766_p4), 130048   ;;  %v992_v40 = vld [vmem:[%s2418_s25 + $0x4] sm:$0xf] (!%p1766_p4)  ;;  %v2212_v41 = vmov (!%p1766_p4), 0.0   ;;  %v1184_v30 = vlaneseq (!%p1766_p4) }
 0x36a   : > { %986 = sbr.rel (%p1766_p4) target bundleno = 1692 (0x69c), region = 167  ;;  %1869 = vmatprep.subr.bf16.mxu0 (!%p1766_p4), %v2212_v41  ;;  %v1004_v42 = vsel (!%p1766_p4), %vm999_vm8, %v991_v39, 0  ;;  %1875 = vmatprep.subr.bf16.mxu1 (!%p1766_p4), %v2212_v41  ;;  %v1050_v43 = vsel (!%p1766_p4), %vm999_vm8, %v992_v40, 0  ;;  %vm2213_vm9 = vmmov (!%p1766_p4), 0   ;;  %v993_v44 = vld [vmem:[%s2418_s25 + $0x8] sm:$0xf] (!%p1766_p4) }
 0x36b   : > { %1870 = vmatpush3.bf16.xpose.msra.mxu0 (!%p1766_p4), %v1004_v42  ;;  %1876 = vmatpush3.bf16.xpose.msra.mxu1 (!%p1766_p4), %v1050_v43  ;;  %v994_v45 = vld [vmem:[%s2418_s25 + $0xc] sm:$0xf] (!%p1766_p4)  ;;  %v987_v46 = vld [vmem:[#allocation2] sm:$0xf] (!%p1766_p4)  ;;  %v988_v47 = vld [vmem:[#allocation2 + $0x4] sm:$0xf] (!%p1766_p4) }
 0x36c   : > { %1871 = vmatprep.mubr.msk.bf16.mxu0 (!%p1766_p4), %vm2213_vm9, %v2212_v41  ;;  %1881 = vmatprep.subr.bf16.mxu0 (!%p1766_p4), %v2212_v41  ;;  %v1096_v48 = vsel (!%p1766_p4), %vm999_vm8, %v993_v44, 0  ;;  %v1142_v49 = vsel (!%p1766_p4), %vm999_vm8, %v994_v45, 0  ;;  %v989_v50 = vld [vmem:[#allocation2 + $0x8] sm:$0xf] (!%p1766_p4)  ;;  %v990_v51 = vld [vmem:[#allocation2 + $0xc] sm:$0xf] (!%p1766_p4) }
 0x36d   : > { %1877 = vmatprep.mubr.msk.bf16.mxu1 (!%p1766_p4), %vm2213_vm9, %v2212_v41  ;;  %1887 = vmatprep.subr.bf16.mxu1 (!%p1766_p4), %v2212_v41  ;;  %v1185_v52 = vshrl.u32 (!%p1766_p4), %v1184_v30, 7  ;;  %v1187_v53 = vand.u32 (!%p1766_p4), 127, %v1184_v30  ;;  %vm1199_vm11 = vcmask (!%p1766_p4), 64512   ;;  %v2214_v14 = vmov (!%p1766_p4), 0   ;;  %v2588_v15 = vld [vmem:[#allocation3] sm:$0xff] (!%p1766_p4)  ;;  %v2593_v18 = vld [vmem:[#allocation3 + $0x8] sm:$0xff] (!%p1766_p4) }
 0x36e   : > { %2049 = vset.pattern.permute.xlu0 (!%p1766_p4), %v2214_v14  ;;  %2050 = vset.pattern.permute.xlu1 (!%p1766_p4), %v2214_v14  ;;  %vm1284_vm12 = vcmask (!%p1766_p4), 7168   ;;  %v2603_v22 = vld [vmem:[#allocation3 + $0x10] sm:$0xff] (!%p1766_p4)  ;;  %v2613_v26 = vld [vmem:[#allocation3 + $0x18] sm:$0xff] (!%p1766_p4)  ;;  %vm1324_vm13 = vcmask (!%p1766_p4), 1043456   ;;  %vm1558_vm14 = vcmask (!%p1766_p4), 125952  }
 0x36f   : > { %vm1188_vm10 = vcmp.le.s32.totalorder (!%p1766_p4), %v1187_v53, %v1185_v52  ;;  %v995_v32 = vld [vmem:[%s2420_s2] sm:$0xf] (!%p1766_p4)  ;;  %v996_v34 = vld [vmem:[%s2420_s2 + $0x4] sm:$0xf] (!%p1766_p4)  ;;  %v998_v53 = vld [vmem:[%s2420_s2 + $0xc] sm:$0xf] (!%p1766_p4) }
 0x370   : > { %v1326_v33 = vsel (!%p1766_p4), %vm1324_vm13, %v995_v32, 0  ;;  %v1372_v35 = vsel (!%p1766_p4), %vm1324_vm13, %v996_v34, 0  ;;  %v1262_v14 = vld [vmem:[#allocation4 + $0x10] sm:$0xff] (!%p1766_p4) }
 0x372   : > { %1872 = vmatmul.mubr.msk.bf16.vlgmr.msra.gmra.mrb[0].mxu0 %vm999_vm8, %v987_v46  ;;  %1878 = vmatmul.mubr.msk.bf16.vlgmr.msra.gmra.mrb[0].mxu1 %vm999_vm8, %v988_v47 }
 0x373   : > { %1882 = vmatpush3.bf16.xpose.msra.mxu0 %v1096_v48  ;;  %1888 = vmatpush3.bf16.xpose.msra.mxu1 %v1142_v49  ;;  %v997_v48 = vld [vmem:[%s2420_s2 + $0x8] sm:$0xf] }
 0x374   : > { %1883 = vmatprep.mubr.msk.bf16.mxu0 %vm2213_vm9, %v2212_v41  ;;  %1889 = vmatprep.mubr.msk.bf16.mxu1 %vm2213_vm9, %v2212_v41  ;;  %v1418_v52 = vsel %vm1324_vm13, %v997_v48, 0  ;;  %v1292_v48 = vld [vmem:[#allocation5 + $0x18] sm:$0xff] }
 0x375   : > { %1893 = vmatprep.subr.bf16.mxu0 %v2212_v41  ;;  %1899 = vmatprep.subr.bf16.mxu1 %v2212_v41 }
 0x37a   : > { %1884 = vmatmul.mubr.msk.bf16.vlgmr.msra.gmra.mrb[4].mxu0 %vm999_vm8, %v989_v50  ;;  %1890 = vmatmul.mubr.msk.bf16.vlgmr.msra.gmra.mrb[4].mxu1 %vm999_vm8, %v990_v51 }
 0x37b   : > { %1895 = vmatprep.mubr.msk.bf16.mxu0 %vm2213_vm9, %v2212_v41  ;;  %1901 = vmatprep.mubr.msk.bf16.mxu1 %vm2213_vm9, %v2212_v41 }
 0x37c   : > { %1894 = vmatpush3.bf16.msra.mxu0 %v1326_v33  ;;  %1900 = vmatpush3.bf16.msra.mxu1 %v1372_v35 }
 0x37d   : > { %1905 = vmatprep.subr.bf16.mxu0 %v2212_v41  ;;  %1911 = vmatprep.subr.bf16.mxu1 %v2212_v41 }
 0x445   : > { %v1040_v54 = vpop.f32.mrb[0].mxu0  ;;  %v1086_v55 = vpop.f32.mrb[0].mxu1 }
 0x446   : > { %v2572_v56 = vsel %vm1188_vm10, %v1040_v54, -inf  ;;  %v1873_v57 = vpop.f32.mrb[1].mxu0  ;;  %v2575_v58 = vsel %vm1188_vm10, %v1086_v55, -inf  ;;  %v1879_v59 = vpop.f32.mrb[1].mxu1 }
 0x447   : > { %v1043_v60 = vpop.f32.mrb[2].mxu0  ;;  %v1200_v61 = vsel %vm1199_vm11, %v2572_v56, -inf  ;;  %v1089_v62 = vpop.f32.mrb[2].mxu1  ;;  %v1203_v1 = vsel %vm1199_vm11, %v2575_v58, -inf  ;;  %v1464_v57 = vsel %vm1324_vm13, %v998_v53, 0 }
 0x448   : > { %1201 = vmax.xlane.f32.xlu0 %v1200_v61  ;;  %v1874_v63 = vpop.f32.mrb[3].mxu0  ;;  %v1880_v0 = vpop.f32.mrb[3].mxu1 }
 0x44c   : > { %1204 = vmax.xlane.f32.xlu0 %v1203_v1 }
 0x44d   : > { %v1132_v2 = vpop.f32.mrb[4].mxu0  ;;  %v1178_v3 = vpop.f32.mrb[4].mxu1 }
 0x44e   : > { %v1193_v4 = vsel %vm1188_vm10, %v1132_v2, -inf  ;;  %v1885_v5 = vpop.f32.mrb[5].mxu0  ;;  %v2583_v6 = vsel %vm1188_vm10, %v1178_v3, -inf  ;;  %v1891_v7 = vpop.f32.mrb[5].mxu1 }
 0x44f   : > { %v1135_v8 = vpop.f32.mrb[6].mxu0  ;;  %v1206_v9 = vsel %vm1199_vm11, %v1193_v4, -inf  ;;  %v1181_v10 = vpop.f32.mrb[6].mxu1  ;;  %v1209_v13 = vsel %vm1199_vm11, %v2583_v6, -inf  ;;  %v1260_v7 = vld [vmem:[#allocation4] sm:$0xff] }
 0x450   : > { %1207 = vmax.xlane.f32.xlu1 %v1206_v9  ;;  %v1886_v11 = vpop.f32.mrb[7].mxu0  ;;  %v1892_v12 = vpop.f32.mrb[7].mxu1  ;;  %v1261_v10 = vld [vmem:[#allocation4 + $0x8] sm:$0xff] }
 0x454   : > { %1210 = vmax.xlane.f32.xlu1 %v1209_v13 }
 0x4d5   : > { %v1202_v16 = vpop.xlane.xlu0 %1201 }
 0x4d6   : > { %v2591_v17 = vmax.f32 %v2588_v15, %v1202_v16 }
 0x4d8   : > { %v1216_v19 = vsub.f32 %v2588_v15, %v2591_v17  ;;  %1514 = vst.msk [vmem:[#allocation3] sm:$0xff] %vm1284_vm12, %v2591_v17  ;;  %1230 = vperm.xlu0 %2049, %v2591_v17  }
 0x4d9   : > { %v1205_v20 = vpop.xlane.xlu0 %1204 }
 0x4da   : > { %v2601_v21 = vmax.f32 %v2593_v18, %v1205_v20  ;;  %v1220_v1 = vmul.f32 1.442695, %v1216_v19 }
 0x4dc   : > { %v1217_v23 = vsub.f32 %v2593_v18, %v2601_v21  ;;  %1515 = vst.msk [vmem:[#allocation3 + $0x8] sm:$0xff] %vm1284_vm12, %v2601_v21  ;;  %1235 = vperm.xlu1 %2050, %v2601_v21   ;;  %v1263_v18 = vld [vmem:[#allocation4 + $0x18] sm:$0xff] }
 0x4dd   : > { %v1208_v24 = vpop.xlane.xlu1 %1207 }
 0x4de   : > { %v2611_v25 = vmax.f32 %v2603_v22, %v1208_v24  ;;  %v1222_v62 = vmul.f32 1.442695, %v1217_v23 }
 0x4e0   : > { %v1218_v27 = vsub.f32 %v2603_v22, %v2611_v25  ;;  %1516 = vst.msk [vmem:[#allocation3 + $0x10] sm:$0xff] %vm1284_vm12, %v2611_v25  ;;  %1240 = vperm.xlu1 %2050, %v2611_v25  }
 0x4e1   : > { %v1211_v28 = vpop.xlane.xlu1 %1210 }
 0x4e2   : > { %v2621_v29 = vmax.f32 %v2613_v26, %v1211_v28 }
 0x4e4   : > { %v1219_v31 = vsub.f32 %v2613_v26, %v2621_v29  ;;  %1517 = vst.msk [vmem:[#allocation3 + $0x18] sm:$0xff] %vm1284_vm12, %v2621_v29  ;;  %1245 = vperm.xlu1 %2050, %v2621_v29  }
 0x4e6   : > { %v1226_v2 = vmul.f32 1.442695, %v1219_v31  ;;  %v1290_v31 = vld [vmem:[#allocation5 + $0x8] sm:$0xff] }
 0x557   : > { %v1231_v36 = vpop.permute.xlu0 %1230 }
 0x558   : > { %v1248_v37 = vsub.f32 %v2572_v56, %v1231_v36 }
 0x55a   : > { %v1252_v38 = vmul.f32 1.442695, %v1248_v37 }
 0x55b   : > { %v1236_v39 = vpop.permute.xlu1 %1235 }
 0x55c   : > { %2051 = vpow2.f32 %v1252_v38  ;;  %v1249_v40 = vsub.f32 %v2575_v58, %v1236_v39 }
 0x55e   : > { %v1254_v42 = vmul.f32 1.442695, %v1249_v40  ;;  %v1291_v40 = vld [vmem:[#allocation5 + $0x10] sm:$0xff] }
 0x55f   : > { %v1241_v43 = vpop.permute.xlu1 %1240 }
 0x560   : > { %2053 = vpow2.f32 %v1254_v42  ;;  %v1250_v44 = vsub.f32 %v1193_v4, %v1241_v43 }
 0x562   : > { %v1256_v45 = vmul.f32 1.442695, %v1250_v44 }
 0x563   : > { %v1246_v46 = vpop.permute.xlu1 %1245 }
 0x564   : > { %2055 = vpow2.f32 %v1256_v45  ;;  %v1251_v47 = vsub.f32 %v2583_v6, %v1246_v46 }
 0x566   : > { %v2052_v49 = vpop.eup %2051  ;;  %v1258_v50 = vmul.f32 1.442695, %v1251_v47 }
 0x567   : > { %v1268_v51 = vsel %vm1199_vm11, %v2052_v49, 0.0  ;;  %v1317_v30 = vpack.c.bf16 %v2052_v49, %v2052_v49 }
 0x568   : > { %2057 = vpow2.f32 %v1258_v50  ;;  %1269 = vadd.xlane.f32.xlu1 %v1268_v51 }
 0x569   : > { %1896 = vmatmul.mubr.msk.bf16.vlgmr.msra.gmra.mrb[8].mxu0 %vm1199_vm11, %v1317_v30  ;;  %2059 = vpow2.f32 %v1222_v62 }
 0x56a   : > { %v2054_v54 = vpop.eup %2053  ;;  %1906 = vmatpush3.bf16.msra.mxu0 %v1418_v52  ;;  %1907 = vmatprep.mubr.msk.bf16.mxu0 %vm2213_vm9, %v2212_v41  ;;  %2061 = vpow2.f32 %v1220_v1 }
 0x56b   : > { %v1271_v55 = vsel %vm1199_vm11, %v2054_v54, 0.0  ;;  %v1318_v56 = vpack.c.bf16 %v2054_v54, %v2054_v54 }
 0x56c   : > { %1272 = vadd.xlane.f32.xlu0 %v1271_v55 }
 0x56d   : > { %1902 = vmatmul.mubr.msk.bf16.vlgmr.msra.gmra.mrb[8].mxu1 %vm1199_vm11, %v1318_v56 }
 0x56e   : > { %v2056_v58 = vpop.eup %2055  ;;  %1912 = vmatpush3.bf16.msra.mxu1 %v1464_v57  ;;  %1913 = vmatprep.mubr.msk.bf16.mxu1 %vm2213_vm9, %v2212_v41  ;;  %v1224_v41 = vmul.f32 1.442695, %v1218_v27  ;;  %v1289_v27 = vld [vmem:[#allocation5] sm:$0xff] }
 0x56f   : > { %v1274_v59 = vsel %vm1199_vm11, %v2056_v58, 0.0  ;;  %v1319_v60 = vpack.c.bf16 %v2056_v58, %v2056_v58 }
 0x570   : > { %1275 = vadd.xlane.f32.xlu1 %v1274_v59  ;;  %2063 = vpow2.f32 %v1224_v41 }
 0x571   : > { %1908 = vmatmul.mubr.msk.bf16.vlgmr.msra.gmra.mrb[12].mxu0 %vm1199_vm11, %v1319_v60  ;;  %2065 = vpow2.f32 %v1226_v2 }
 0x572   : > { %v2058_v61 = vpop.eup %2057 }
 0x573   : > { %v1277_v63 = vsel %vm1199_vm11, %v2058_v61, 0.0  ;;  %v1320_v0 = vpack.c.bf16 %v2058_v61, %v2058_v61  ;;  %v2060_v3 = vpop.eup %2059 }
 0x574   : > { %1278 = vadd.xlane.f32.xlu1 %v1277_v63  ;;  %v2062_v4 = vpop.eup %2061  ;;  %v1265_v12 = vmul.f32 %v2060_v3, %v1261_v10 }
 0x575   : > { %1914 = vmatmul.mubr.msk.bf16.vlgmr.msra.gmra.mrb[12].mxu1 %vm1199_vm11, %v1320_v0  ;;  %v1264_v8 = vmul.f32 %v2062_v4, %v1260_v7 }
 0x57a   : > { %v2064_v5 = vpop.eup %2063 }
 0x57b   : > { %v2066_v6 = vpop.eup %2065  ;;  %v1266_v16 = vmul.f32 %v2064_v5, %v1262_v14 }
 0x57c   : > { %v1267_v21 = vmul.f32 %v2066_v6, %v1263_v18 }
 0x582   : > { %1300 = vperm.xlu0 %2049, %v2060_v3  }
 0x585   : > { %1295 = vperm.xlu1 %2050, %v2062_v4  }
 0x589   : > { %1305 = vperm.xlu1 %2050, %v2064_v5  }
 0x58d   : > { %1310 = vperm.xlu1 %2050, %v2066_v6  }
 0x5f5   : > { %v1270_v9 = vpop.xlane.xlu1 %1269 }
 0x5f6   : > { %v1280_v11 = vadd.f32 %v1270_v9, %v1264_v8 }
 0x5f8   : > { %1285 = vst.msk [vmem:[#allocation4] sm:$0xff] %vm1284_vm12, %v1280_v11 }
 0x5f9   : > { %v1273_v13 = vpop.xlane.xlu0 %1272 }
 0x5fa   : > { %v1281_v15 = vadd.f32 %v1273_v13, %v1265_v12 }
 0x5fc   : > { %1286 = vst.msk [vmem:[#allocation4 + $0x8] sm:$0xff] %vm1284_vm12, %v1281_v15 }
 0x5fd   : > { %v1276_v17 = vpop.xlane.xlu1 %1275 }
 0x5fe   : > { %v1282_v19 = vadd.f32 %v1276_v17, %v1266_v16 }
 0x5ff   : > { %v1522_v20 = vld [vmem:[#allocation4] sm:$0xff] }
 0x600   : > { %1287 = vst.msk [vmem:[#allocation4 + $0x10] sm:$0xff] %vm1284_vm12, %v1282_v19  ;;  %1528 = vperm.xlu1 %2050, %v1522_v20  }
 0x601   : > { %v1279_v22 = vpop.xlane.xlu1 %1278  ;;  %v1301_v32 = vpop.permute.xlu0 %1300 }
 0x602   : > { %v1283_v23 = vadd.f32 %v1279_v22, %v1267_v21  ;;  %v1314_v38 = vmul.f32 %v1301_v32, %v1290_v31 }
 0x603   : > { %v1523_v24 = vld [vmem:[#allocation4 + $0x8] sm:$0xff] }
 0x604   : > { %1288 = vst.msk [vmem:[#allocation4 + $0x18] sm:$0xff] %vm1284_vm12, %v1283_v23  ;;  %1533 = vperm.xlu0 %2049, %v1523_v24  }
 0x605   : > { %v1296_v28 = vpop.permute.xlu1 %1295 }
 0x606   : > { %v1313_v29 = vmul.f32 %v1296_v28, %v1289_v27 }
 0x607   : > { %v1524_v25 = vld [vmem:[#allocation4 + $0x10] sm:$0xff] }
 0x608   : > { %1538 = vperm.xlu1 %2050, %v1524_v25  }
 0x609   : > { %v1306_v36 = vpop.permute.xlu1 %1305 }
 0x60a   : > { %v1315_v46 = vmul.f32 %v1306_v36, %v1291_v40 }
 0x60b   : > { %v1525_v26 = vld [vmem:[#allocation4 + $0x18] sm:$0xff] }
 0x60c   : > { %1543 = vperm.xlu0 %2049, %v1525_v26  }
 0x60d   : > { %v1311_v49 = vpop.permute.xlu1 %1310 }
 0x60e   : > { %v1316_v53 = vmul.f32 %v1311_v49, %v1292_v48 }
 0x63c   : > { %v1362_v33 = vpop.f32.mrb[8].mxu0 }
 0x63d   : > { %v1506_v34 = vadd.f32 %v1362_v33, %v1313_v29  ;;  %v1897_v35 = vpop.f32.mrb[9].mxu0 }
 0x63e   : > { %v1365_v37 = vpop.f32.mrb[10].mxu0 }
 0x63f   : > { %1510 = vst.msk [vmem:[#allocation5] sm:$0xff] %vm999_vm8, %v1506_v34  ;;  %v1898_v39 = vpop.f32.mrb[11].mxu0 }
 0x640   : > { %v1408_v42 = vpop.f32.mrb[8].mxu1 }
 0x641   : > { %v1507_v43 = vadd.f32 %v1408_v42, %v1314_v38  ;;  %v1903_v44 = vpop.f32.mrb[9].mxu1 }
 0x642   : > { %v1411_v45 = vpop.f32.mrb[10].mxu1 }
 0x643   : > { %1511 = vst.msk [vmem:[#allocation5 + $0x8] sm:$0xff] %vm999_vm8, %v1507_v43  ;;  %v1904_v47 = vpop.f32.mrb[11].mxu1 }
 0x644   : > { %v1454_v50 = vpop.f32.mrb[12].mxu0 }
 0x645   : > { %v1508_v51 = vadd.f32 %v1454_v50, %v1315_v46  ;;  %v1909_v30 = vpop.f32.mrb[13].mxu0 }
 0x646   : > { %v1457_v52 = vpop.f32.mrb[14].mxu0  ;;  %v1518_v0 = vld [vmem:[#allocation5] sm:$0xff] }
 0x647   : > { %1512 = vst.msk [vmem:[#allocation5 + $0x10] sm:$0xff] %vm999_vm8, %v1508_v51  ;;  %v1910_v54 = vpop.f32.mrb[15].mxu0 }
 0x648   : > { %v1500_v55 = vpop.f32.mrb[12].mxu1 }
 0x649   : > { %v1509_v56 = vadd.f32 %v1500_v55, %v1316_v53  ;;  %v1915_v57 = vpop.f32.mrb[13].mxu1 }
 0x64a   : > { %v1503_v58 = vpop.f32.mrb[14].mxu1  ;;  %v1519_v4 = vld [vmem:[#allocation5 + $0x8] sm:$0xff] }
 0x64b   : > { %1513 = vst.msk [vmem:[#allocation5 + $0x18] sm:$0xff] %vm999_vm8, %v1509_v56  ;;  %v1916_v59 = vpop.f32.mrb[15].mxu1 }
 0x64e   : > { %v1520_v8 = vld [vmem:[#allocation5 + $0x10] sm:$0xff] }
 0x652   : > { %v1521_v12 = vld [vmem:[#allocation5 + $0x18] sm:$0xff] }
 0x67f   : > { %v1529_v60 = vpop.permute.xlu1 %1528 }
 0x680   : > { %2067 = vrcp.f32 %v1529_v60 }
 0x683   : > { %v1534_v61 = vpop.permute.xlu0 %1533 }
 0x684   : > { %2069 = vrcp.f32 %v1534_v61 }
 0x687   : > { %v1539_v62 = vpop.permute.xlu1 %1538 }
 0x688   : > { %2071 = vrcp.f32 %v1539_v62 }
 0x68a   : > { %v2068_v63 = vpop.eup %2067 }
 0x68b   : > { %v1547_v1 = vmul.f32 %v2068_v63, %v1518_v0  ;;  %v1544_v41 = vpop.permute.xlu0 %1543 }
 0x68c   : > { %2073 = vrcp.f32 %v1544_v41 }
 0x68d   : > { %v1554_v2 = vpack.c.bf16 %v1547_v1, %v1547_v1 }
 0x68e   : > { %v2070_v3 = vpop.eup %2069 }
 0x68f   : > { %1559 = vst.msk [vmem:[%s2422_s3] sm:$0xf] %vm1558_vm14, %v1554_v2  ;;  %v1549_v5 = vmul.f32 %v2070_v3, %v1519_v4 }
 0x691   : > { %v1555_v6 = vpack.c.bf16 %v1549_v5, %v1549_v5 }
 0x692   : > { %v2072_v7 = vpop.eup %2071 }
 0x693   : > { %1560 = vst.msk [vmem:[%s2422_s3 + $0x4] sm:$0xf] %vm1558_vm14, %v1555_v6  ;;  %v1551_v9 = vmul.f32 %v2072_v7, %v1520_v8 }
 0x695   : > { %v1556_v10 = vpack.c.bf16 %v1551_v9, %v1551_v9 }
 0x696   : > { %v2074_v11 = vpop.eup %2073 }
 0x697   : > { %1561 = vst.msk [vmem:[%s2422_s3 + $0x8] sm:$0xf] %vm1558_vm14, %v1556_v10  ;;  %v1553_v13 = vmul.f32 %v2074_v11, %v1521_v12 }
 0x699   : > { %v1557_v14 = vpack.c.bf16 %v1553_v13, %v1553_v13 }
 0x69b   : > { %1562 = vst.msk [vmem:[%s2422_s3 + $0xc] sm:$0xf] %vm1558_vm14, %v1557_v14 }
 0x69c PF: > { %1569 = sbr.rel (!%p2373_p10) target bundleno = 1709 (0x6ad), region = 171  ;;  %s2760_s2 = sld [smem:[#allocation16_spill]] (%p2373_p10)  ;;  %v1590_v15 = vld [vmem:[%s2422_s3] sm:$0xf] (%p2373_p10)  ;;  %v1592_v16 = vld [vmem:[%s2422_s3 + $0x4] sm:$0xf] (%p2373_p10) }
 0x69d   : > { %s2761_s1 = sld [smem:[#allocation17_spill]] (%p2373_p10)  ;;  %s2762_s0 = sld [smem:[#allocation23_spill]] (%p2373_p10) }
 0x69e   : > { %v1594_v17 = vld [vmem:[%s2422_s3 + $0x8] sm:$0xf] (%p2373_p10) }
 0x6a2   : > { %s1570_s7 = sld [smem:[#allocation7 + %s2760_s2]] (%p2373_p10)  ;;  %v1596_v18 = vld [vmem:[%s2422_s3 + $0xc] sm:$0xf] (%p2373_p10) }
 0x6a3   : > { %s1776_s24 = sshll.u32 %s2761_s1, 3 }
 0x6a8   : > { %s1572_s26 = sadd.s32 %s1776_s24, %s1570_s7 }
 0x6a9   : > { %s1777_s16 = sshll.u32 %s1572_s26, 2 }
 0x6aa   : > { %s1574_s5 = scalar_lea.vmem %s2762_s0, %s1777_s16 }
 0x6ab   : > { %1591 = vst [vmem:[%s1574_s5] sm:$0xf] %v1590_v15  ;;  %1593 = vst [vmem:[%s1574_s5 + $0x8] sm:$0xf] %v1592_v16 }
 0x6ac   : > { %1595 = vst [vmem:[%s1574_s5 + $0x10] sm:$0xf] %v1594_v17  ;;  %1597 = vst [vmem:[%s1574_s5 + $0x18] sm:$0xf] %v1596_v18 }
 0x6ad PF: > { %s25_s13 = sadd.s32 1, %s2203_s13   ;;  %s2764_s3 = sld [smem:[#allocation20_spill]] }
 0x6ae   : > { %p2687_p5 = scmp.ge.s32.totalorder %s25_s13, 8   ;;  %s2765_s18 = sld [smem:[#allocation19_spill]] }
 0x6af   : > { %s2766_s20 = sld [smem:[#allocation18_spill]]  ;;  %s2767_s1 = smov %s2159_s27 }
 0x6b0   : > { %s2768_s27 = smov %s2379_s28  ;;  %s2769_s28 = smov %s2167_s29 }
 0x6b1   : > { %s2770_s29 = smov %s2371_s17  ;;  %s2771_s30 = smov %s2175_s6 }
 0x6b2   : > { %s2773_s7 = smov %s2183_s8  ;;  %s2775_s9 = smov %s2195_s11 }
 0x6b3   : > { %s2772_s6 = smov %s2764_s3  ;;  %s2776_s10 = smov %s2199_s12 }
 0x6b4   : > { %s2774_s8 = smov %s2765_s18  ;;  %s2777_s11 = smov %s2780_s14 }
 0x6b5   : > { %s2778_s12 = smov %s2766_s20  ;;  %24 = sbr.rel (!%p2687_p5) target bundleno = 34 (0x22), region = 259 }

</bundles_post_ra>
